<compile_context>
chip_gen: v7x
topology: tpu7x:2x2x1
jax: 0.10.0
libtpu: 0.0.40
codegen_flags: <defaults>
</compile_context>

<pallas_src>
import functools

import jax
import jax.numpy as jnp
from jax import lax
from jax.experimental import pallas as pl
from jax.experimental.pallas import tpu as pltpu


_HALO = 128   # lane halo on each side of the staged activations (multiple of 128)
_SLAB = 8     # channel slab size of the packed weight/param input (>= max channel count)


def _mask_block_kernel(x_ref, pw_ref, o_ref, a1_ref, a2_ref,
                       *, N, H, W, Cin, Cm, Co, Mr):
    """Single grid-step kernel: the whole (toy-sized) problem lives in VMEM.

    x_ref  : (N, Cin, H*W)      input images, channel-major per image
    pw_ref : (20, 8, 8)         packed weights + per-channel params (see pack fn)
    o_ref  : (N, Co, H*W)       output images
    a1_ref : (Cin, Mr + 2*HALO) staged relu(bn1(x)), batch folded onto lanes
    a2_ref : (Cm,  Mr + 2*HALO) staged relu(bn2(conv1)) * fisher mask
    """
    HW = H * W
    OFF = _HALO

    # ---- packed per-channel params (slab 19, columns: [s1, b1, s2, b2, mask]) ----
    prm = pw_ref[19]                                   # (8, 8), one tiny load
    s1 = prm[:Cin, 0:1]
    b1 = prm[:Cin, 1:2]
    s2 = prm[:Cm, 2:3]
    b2 = prm[:Cm, 3:4]
    fmask = prm[:Cm, 4:5]

    # ---- lane-index coordinates used to build the 'same'-padding tap masks ----
    lane = lax.broadcasted_iota(jnp.int32, (1, Mr), 1)
    if (W & (W - 1)) == 0 and (H & (H - 1)) == 0:      # powers of two: shifts/ands only
        xi = lane & (W - 1)
        yi = (lane >> (W.bit_length() - 1)) & (H - 1)
    else:
        xi = lane % W
        yi = (lane // W) % H

    def tap_select(dy, dx, src):
        """Zero lanes whose (dy, dx) neighbour falls outside its image (NaN-safe)."""
        m = None
        if dy < 0:
            m = yi >= -dy
        elif dy > 0:
            m = yi < H - dy
        if dx < 0:
            mx = xi >= -dx
            m = mx if m is None else jnp.logical_and(m, mx)
        elif dx > 0:
            mx = xi < W - dx
            m = mx if m is None else jnp.logical_and(m, mx)
        if m is None:                                   # centre tap: all lanes valid
            return src
        return jnp.where(m, src, 0.0)

    def conv3x3(a_ref, cin, cout, slab_base):
        """3x3 'same' conv as 9 accumulating MXU dots fed from lane-shifted slices."""
        acc = None
        t = 0
        for dy in (-1, 0, 1):
            for dx in (-1, 0, 1):
                d = dy * W + dx
                src = tap_select(dy, dx, a_ref[:, OFF + d:OFF + d + Mr])   # (cin, Mr)
                w = pw_ref[slab_base + t][:cout, :cin]                     # (cout, cin)
                part = jnp.dot(w, src, preferred_element_type=jnp.float32)
                acc = part if acc is None else acc + part
                t += 1
        return acc                                                          # (cout, Mr)

    # ---- stage a1 = relu(bn1(x)); batch folded onto lanes at 128-aligned offsets ----
    # Halo / tail lanes are only ever read through tap_select (a select, not a
    # multiply), so no zero fills are needed anywhere.
    for n in range(N):
        a1_ref[:, OFF + n * HW:OFF + (n + 1) * HW] = jnp.maximum(
            x_ref[n] * s1 + b1, 0.0)

    # ---- conv1 -> bn2 -> relu2 -> fisher channel mask, staged for conv2 ----
    acc1 = conv3x3(a1_ref, Cin, Cm, 0)                                     # (Cm, Mr)
    a2_ref[:, OFF:OFF + Mr] = jnp.maximum(acc1 * s2 + b2, 0.0) * fmask

    # ---- conv2 + fused 1x1 convShortcut(relu(bn1(x))) ----
    acc2 = jnp.dot(pw_ref[18][:Co, :Cin], a1_ref[:, OFF:OFF + Mr],
                   preferred_element_type=jnp.float32)                     # shortcut
    acc2 = acc2 + conv3x3(a2_ref, Cm, Co, 9)                               # (Co, Mr)

    # ---- write back per image so the wrapper needs no transpose HLO ----
    for n in range(N):
        o_ref[n] = acc2[:, n * HW:(n + 1) * HW]


def pack_mask_block_params(s1, b1, w1, s2, b2, fisher_mask, w2, ws):
    """LOAD-TIME packing (run once, outside the forward hot path).

    Packs both 3x3 conv weights, the 1x1 shortcut weight and the five per-channel
    vectors into a single (20, 8, 8) f32 slab so the kernel needs ONE parameter DMA:
      slabs  0..8 : conv1 tap (ky,kx) weights, (Cm, Cin) zero-padded to (8, 8)
      slabs 9..17 : conv2 tap weights,         (Co, Cm)  zero-padded to (8, 8)
      slab     18 : 1x1 convShortcut weights,  (Co, Cin) zero-padded to (8, 8)
      slab     19 : columns [s1, b1, s2, b2, fisher_mask] (channel index on rows)
    """
    Cm, Cin = w1.shape[0], w1.shape[1]
    Co = w2.shape[0]
    assert max(Cin, Cm, Co) <= _SLAB, \
        "TODO(synk): widen the packing slab for real WideResNet widths"
    pw = jnp.zeros((2 * 9 + 2, _SLAB, _SLAB), jnp.float32)
    for t in range(9):
        pw = pw.at[t, :Cm, :Cin].set(w1[:, :, t // 3, t % 3])
        pw = pw.at[9 + t, :Co, :Cm].set(w2[:, :, t // 3, t % 3])
    pw = pw.at[18, :Co, :Cin].set(ws.reshape(Co, Cin))
    pw = pw.at[19, :Cin, 0].set(s1)
    pw = pw.at[19, :Cin, 1].set(b1)
    pw = pw.at[19, :Cm, 2].set(s2)
    pw = pw.at[19, :Cm, 3].set(b2)
    pw = pw.at[19, :Cm, 4].set(fisher_mask)
    return pw


def mask_block_forward(x_nchw, packed, out_channels):
    """MaskBlock forward (eval-mode BN, stride=1, dropRate=0, equalInOut=False).

    x_nchw: (N, Cin, H, W) float32.  packed: output of pack_mask_block_params().
    Returns (N, out_channels, H, W) float32.
    """
    N, Cin, H, W = x_nchw.shape
    Co = Cm = out_channels
    HW = H * W
    M = N * HW
    Mr = ((M + 127) // 128) * 128            # lane-dense working width
    assert W + 1 <= _HALO, "halo must cover the largest 3x3 tap shift (W+1 lanes)"
    Mtot = Mr + 2 * _HALO

    x3 = x_nchw.reshape(N, Cin, HW)          # contiguous reshape: no data movement

    kernel = functools.partial(_mask_block_kernel, N=N, H=H, W=W,
                               Cin=Cin, Cm=Cm, Co=Co, Mr=Mr)

    out = pl.pallas_call(
        kernel,
        out_shape=jax.ShapeDtypeStruct((N, Co, HW), jnp.float32),
        grid_spec=pltpu.PrefetchScalarGridSpec(
            num_scalar_prefetch=0,
            grid=(1,),                       # whole toy-sized problem in one step
            in_specs=[
                pl.BlockSpec((N, Cin, HW), lambda i: (0, 0, 0)),
                pl.BlockSpec(packed.shape, lambda i: (0, 0, 0)),
            ],
            out_specs=pl.BlockSpec((N, Co, HW), lambda i: (0, 0, 0)),
            scratch_shapes=[
                pltpu.VMEM((Cin, Mtot), jnp.float32),
                pltpu.VMEM((Cm, Mtot), jnp.float32),
            ],
        ),
        compiler_params=pltpu.CompilerParams(
            dimension_semantics=("arbitrary",)),
    )(x3, packed)

    return out.reshape(N, Co, H, W)          # contiguous reshape: no data movement


def reference_forward(x, gamma1, beta1, mean1, var1, w1,
                      gamma2, beta2, mean2, var2, w2, ws, cmask, eps=1e-5):
    def bn(y, g, b, m, v):
        inv = g / jnp.sqrt(v + eps)
        return y * inv[None, :, None, None] + (b - m * inv)[None, :, None, None]

    def conv(y, w, pad):
        return lax.conv_general_dilated(
            y, w, (1, 1), ((pad, pad), (pad, pad)),
            dimension_numbers=('NCHW', 'OIHW', 'NCHW'))

    a1 = jnp.maximum(bn(x, gamma1, beta1, mean1, var1), 0.0)      # relu1(bn1(x))
    out = conv(a1, w1, 1)                                          # conv1
    out = jnp.maximum(bn(out, gamma2, beta2, mean2, var2), 0.0)    # relu2(bn2)
    out = out * cmask[None, :, None, None]                         # fisher mask
    out = conv(out, w2, 1)                                         # conv2
    sc = conv(a1, ws, 0)                                           # convShortcut
    return sc + out


if __name__ == "__main__":
    N, Cin, Cout, H, W = 2, 4, 8, 16, 16
    eps = 1e-5

    key = jax.random.PRNGKey(0)
    ks = jax.random.split(key, 12)

    x = jax.random.normal(ks[0], (N, Cin, H, W), jnp.float32)

    gamma1 = 1.0 + 0.1 * jax.random.normal(ks[1], (Cin,), jnp.float32)
    beta1 = 0.1 * jax.random.normal(ks[2], (Cin,), jnp.float32)
    mean1 = 0.1 * jax.random.normal(ks[3], (Cin,), jnp.float32)
    var1 = jax.random.uniform(ks[4], (Cin,), jnp.float32, 0.5, 1.5)

    w1 = jax.random.normal(ks[5], (Cout, Cin, 3, 3), jnp.float32) / (Cin * 9) ** 0.5

    gamma2 = 1.0 + 0.1 * jax.random.normal(ks[6], (Cout,), jnp.float32)
    beta2 = 0.1 * jax.random.normal(ks[7], (Cout,), jnp.float32)
    mean2 = 0.1 * jax.random.normal(ks[8], (Cout,), jnp.float32)
    var2 = jax.random.uniform(ks[9], (Cout,), jnp.float32, 0.5, 1.5)

    w2 = jax.random.normal(ks[10], (Cout, Cout, 3, 3), jnp.float32) / (Cout * 9) ** 0.5
    ws = jax.random.normal(ks[11], (Cout, Cin, 1, 1), jnp.float32) / Cin ** 0.5

    cmask = jnp.ones((Cout,), jnp.float32)   # what _create_mask produces on first forward

    # Load-time glue (runs once, outside the forward hot path):
    # fused eval-mode BatchNorm affine (y = x*scale + bias) and parameter packing.
    s1 = gamma1 / jnp.sqrt(var1 + eps)
    b1 = beta1 - mean1 * s1
    s2 = gamma2 / jnp.sqrt(var2 + eps)
    b2 = beta2 - mean2 * s2
    packed = jax.block_until_ready(
        pack_mask_block_params(s1, b1, w1, s2, b2, cmask, w2, ws))

    out = mask_block_forward(x, packed, Cout)
    out = jax.block_until_ready(out)

    ref = reference_forward(x, gamma1, beta1, mean1, var1, w1,
                            gamma2, beta2, mean2, var2, w2, ws, cmask, eps)
    ref = jax.block_until_ready(ref)

    assert out.shape == (N, Cout, H, W), out.shape
    assert jnp.allclose(out, ref, atol=1e-4, rtol=1e-4), float(jnp.max(jnp.abs(out - ref)))

    print("KERNEL_OK")
</pallas_src>

<mosaic_0001>
module attributes {stable_mosaic.version = 11 : i64} {
  func.func @_mask_block_kernel(%arg0: i32, %arg1: memref<2x4x256xf32, #tpu.memory_space<vmem>>, %arg2: memref<20x8x8xf32, #tpu.memory_space<vmem>>, %arg3: memref<2x8x256xf32, #tpu.memory_space<vmem>>, %arg4: memref<4x768xf32, #tpu.memory_space<vmem>>, %arg5: memref<8x768xf32, #tpu.memory_space<vmem>>) attributes {dimension_semantics = [#tpu.dimension_semantics<arbitrary>], iteration_bounds = array<i64: 1>, scalar_prefetch = 0 : i64, scratch_operands = 2 : i64, tpu.core_type = #tpu.core_type<tc>, window_params = [{pipeline_mode = #tpu.pipeline_mode<synchronous>, transform_indices = @transform_0, window_bounds = array<i64: 2, 4, 256>}, {pipeline_mode = #tpu.pipeline_mode<synchronous>, transform_indices = @transform_1, window_bounds = array<i64: 20, 8, 8>}, {pipeline_mode = #tpu.pipeline_mode<synchronous>, transform_indices = @transform_2, window_bounds = array<i64: 2, 8, 256>}]} {
    %c19 = arith.constant 19 : index
    %c0 = arith.constant 0 : index
    %c0_0 = arith.constant 0 : index
    %0 = vector.load %arg2[%c19, %c0, %c0_0] : memref<20x8x8xf32, #tpu.memory_space<vmem>>, vector<1x8x8xf32>
    %1 = vector.shape_cast %0 : vector<1x8x8xf32> to vector<8x8xf32>
    %2 = vector.extract_strided_slice %1 {offsets = [0, 0], sizes = [4, 1], strides = [1, 1]} : vector<8x8xf32> to vector<4x1xf32>
    %3 = vector.extract_strided_slice %1 {offsets = [0, 1], sizes = [4, 1], strides = [1, 1]} : vector<8x8xf32> to vector<4x1xf32>
    %4 = vector.extract_strided_slice %1 {offsets = [0, 2], sizes = [8, 1], strides = [1, 1]} : vector<8x8xf32> to vector<8x1xf32>
    %5 = vector.extract_strided_slice %1 {offsets = [0, 3], sizes = [8, 1], strides = [1, 1]} : vector<8x8xf32> to vector<8x1xf32>
    %6 = vector.extract_strided_slice %1 {offsets = [0, 4], sizes = [8, 1], strides = [1, 1]} : vector<8x8xf32> to vector<8x1xf32>
    %7 = tpu.iota {dimensions = array<i32: 1>} : vector<1x512xi32>
    %c15_i32 = arith.constant 15 : i32
    %8 = vector.broadcast %c15_i32 : i32 to vector<1x512xi32>
    %9 = arith.andi %7, %8 : vector<1x512xi32>
    %c4_i32 = arith.constant 4 : i32
    %10 = vector.broadcast %c4_i32 : i32 to vector<1x512xi32>
    %11 = arith.shrsi %7, %10 : vector<1x512xi32>
    %c15_i32_1 = arith.constant 15 : i32
    %12 = vector.broadcast %c15_i32_1 : i32 to vector<1x512xi32>
    %13 = arith.andi %11, %12 : vector<1x512xi32>
    %c0_2 = arith.constant 0 : index
    %c0_3 = arith.constant 0 : index
    %c0_4 = arith.constant 0 : index
    %14 = vector.load %arg1[%c0_2, %c0_3, %c0_4] : memref<2x4x256xf32, #tpu.memory_space<vmem>>, vector<1x4x256xf32>
    %15 = vector.shape_cast %14 : vector<1x4x256xf32> to vector<4x256xf32>
    %16 = vector.broadcast %2 : vector<4x1xf32> to vector<4x256xf32>
    %17 = arith.mulf %15, %16 : vector<4x256xf32>
    %18 = vector.broadcast %3 : vector<4x1xf32> to vector<4x256xf32>
    %19 = arith.addf %17, %18 : vector<4x256xf32>
    %cst = arith.constant 0.000000e+00 : f32
    %20 = vector.broadcast %cst : f32 to vector<4x256xf32>
    %21 = arith.maximumf %19, %20 : vector<4x256xf32>
    %c0_5 = arith.constant 0 : index
    %c128 = arith.constant 128 : index
    %22 = vector.load %arg4[%c0_5, %c128] : memref<4x768xf32, #tpu.memory_space<vmem>>, vector<4x256xf32>
    tpu.vector_store %arg4[%c0_5, %c128], %21 {strides = array<i32>} : memref<4x768xf32, #tpu.memory_space<vmem>>, vector<4x256xf32>,
    %c1 = arith.constant 1 : index
    %c0_6 = arith.constant 0 : index
    %c0_7 = arith.constant 0 : index
    %23 = vector.load %arg1[%c1, %c0_6, %c0_7] : memref<2x4x256xf32, #tpu.memory_space<vmem>>, vector<1x4x256xf32>
    %24 = vector.shape_cast %23 : vector<1x4x256xf32> to vector<4x256xf32>
    %25 = vector.broadcast %2 : vector<4x1xf32> to vector<4x256xf32>
    %26 = arith.mulf %24, %25 : vector<4x256xf32>
    %27 = vector.broadcast %3 : vector<4x1xf32> to vector<4x256xf32>
    %28 = arith.addf %26, %27 : vector<4x256xf32>
    %cst_8 = arith.constant 0.000000e+00 : f32
    %29 = vector.broadcast %cst_8 : f32 to vector<4x256xf32>
    %30 = arith.maximumf %28, %29 : vector<4x256xf32>
    %c0_9 = arith.constant 0 : index
    %c384 = arith.constant 384 : index
    %31 = vector.load %arg4[%c0_9, %c384] : memref<4x768xf32, #tpu.memory_space<vmem>>, vector<4x256xf32>
    tpu.vector_store %arg4[%c0_9, %c384], %30 {strides = array<i32>} : memref<4x768xf32, #tpu.memory_space<vmem>>, vector<4x256xf32>,
    %c0_10 = arith.constant 0 : index
    %c111 = arith.constant 111 : index
    %32 = vector.load %arg4[%c0_10, %c111] : memref<4x768xf32, #tpu.memory_space<vmem>>, vector<4x512xf32>
    %c1_i32 = arith.constant 1 : i32
    %33 = vector.broadcast %c1_i32 : i32 to vector<1x512xi32>
    %34 = arith.cmpi sge, %13, %33 : vector<1x512xi32>
    %c1_i32_11 = arith.constant 1 : i32
    %35 = vector.broadcast %c1_i32_11 : i32 to vector<1x512xi32>
    %36 = arith.cmpi sge, %9, %35 : vector<1x512xi32>
    %37 = arith.andi %34, %36 : vector<1x512xi1>
    %cst_12 = arith.constant 0.000000e+00 : f32
    %38 = vector.shape_cast %37 : vector<1x512xi1> to vector<1x512xi1>
    %39 = vector.broadcast %38 : vector<1x512xi1> to vector<4x512xi1>
    %40 = vector.broadcast %cst_12 : f32 to vector<4x512xf32>
    %41 = arith.select %39, %32, %40 : vector<4x512xi1>, vector<4x512xf32>
    %c0_13 = arith.constant 0 : index
    %c0_14 = arith.constant 0 : index
    %c0_15 = arith.constant 0 : index
    %42 = vector.load %arg2[%c0_13, %c0_14, %c0_15] : memref<20x8x8xf32, #tpu.memory_space<vmem>>, vector<1x8x8xf32>
    %43 = vector.shape_cast %42 : vector<1x8x8xf32> to vector<8x8xf32>
    %44 = vector.extract_strided_slice %43 {offsets = [0, 0], sizes = [8, 4], strides = [1, 1]} : vector<8x8xf32> to vector<8x4xf32>
    %cst_16 = arith.constant dense<0.000000e+00> : vector<8x512xf32>
    %45 = tpu.matmul %44, %41, %cst_16 {dimension_numbers = #tpu.dot_dimension_numbers<[1], [0], [0], [1], [0, 0, 1, 1], [], []>} : vector<8x4xf32>, vector<4x512xf32>, vector<8x512xf32> -> vector<8x512xf32>
    %c0_17 = arith.constant 0 : index
    %c112 = arith.constant 112 : index
    %46 = vector.load %arg4[%c0_17, %c112] : memref<4x768xf32, #tpu.memory_space<vmem>>, vector<4x512xf32>
    %c1_i32_18 = arith.constant 1 : i32
    %47 = vector.broadcast %c1_i32_18 : i32 to vector<1x512xi32>
    %48 = arith.cmpi sge, %13, %47 : vector<1x512xi32>
    %cst_19 = arith.constant 0.000000e+00 : f32
    %49 = vector.shape_cast %48 : vector<1x512xi1> to vector<1x512xi1>
    %50 = vector.broadcast %49 : vector<1x512xi1> to vector<4x512xi1>
    %51 = vector.broadcast %cst_19 : f32 to vector<4x512xf32>
    %52 = arith.select %50, %46, %51 : vector<4x512xi1>, vector<4x512xf32>
    %c1_20 = arith.constant 1 : index
    %c0_21 = arith.constant 0 : index
    %c0_22 = arith.constant 0 : index
    %53 = vector.load %arg2[%c1_20, %c0_21, %c0_22] : memref<20x8x8xf32, #tpu.memory_space<vmem>>, vector<1x8x8xf32>
    %54 = vector.shape_cast %53 : vector<1x8x8xf32> to vector<8x8xf32>
    %55 = vector.extract_strided_slice %54 {offsets = [0, 0], sizes = [8, 4], strides = [1, 1]} : vector<8x8xf32> to vector<8x4xf32>
    %cst_23 = arith.constant dense<0.000000e+00> : vector<8x512xf32>
    %56 = tpu.matmul %55, %52, %cst_23 {dimension_numbers = #tpu.dot_dimension_numbers<[1], [0], [0], [1], [0, 0, 1, 1], [], []>} : vector<8x4xf32>, vector<4x512xf32>, vector<8x512xf32> -> vector<8x512xf32>
    %57 = arith.addf %45, %56 : vector<8x512xf32>
    %c0_24 = arith.constant 0 : index
    %c113 = arith.constant 113 : index
    %58 = vector.load %arg4[%c0_24, %c113] : memref<4x768xf32, #tpu.memory_space<vmem>>, vector<4x512xf32>
    %c1_i32_25 = arith.constant 1 : i32
    %59 = vector.broadcast %c1_i32_25 : i32 to vector<1x512xi32>
    %60 = arith.cmpi sge, %13, %59 : vector<1x512xi32>
    %c15_i32_26 = arith.constant 15 : i32
    %61 = vector.broadcast %c15_i32_26 : i32 to vector<1x512xi32>
    %62 = arith.cmpi slt, %9, %61 : vector<1x512xi32>
    %63 = arith.andi %60, %62 : vector<1x512xi1>
    %cst_27 = arith.constant 0.000000e+00 : f32
    %64 = vector.shape_cast %63 : vector<1x512xi1> to vector<1x512xi1>
    %65 = vector.broadcast %64 : vector<1x512xi1> to vector<4x512xi1>
    %66 = vector.broadcast %cst_27 : f32 to vector<4x512xf32>
    %67 = arith.select %65, %58, %66 : vector<4x512xi1>, vector<4x512xf32>
    %c2 = arith.constant 2 : index
    %c0_28 = arith.constant 0 : index
    %c0_29 = arith.constant 0 : index
    %68 = vector.load %arg2[%c2, %c0_28, %c0_29] : memref<20x8x8xf32, #tpu.memory_space<vmem>>, vector<1x8x8xf32>
    %69 = vector.shape_cast %68 : vector<1x8x8xf32> to vector<8x8xf32>
    %70 = vector.extract_strided_slice %69 {offsets = [0, 0], sizes = [8, 4], strides = [1, 1]} : vector<8x8xf32> to vector<8x4xf32>
    %cst_30 = arith.constant dense<0.000000e+00> : vector<8x512xf32>
    %71 = tpu.matmul %70, %67, %cst_30 {dimension_numbers = #tpu.dot_dimension_numbers<[1], [0], [0], [1], [0, 0, 1, 1], [], []>} : vector<8x4xf32>, vector<4x512xf32>, vector<8x512xf32> -> vector<8x512xf32>
    %72 = arith.addf %57, %71 : vector<8x512xf32>
    %c0_31 = arith.constant 0 : index
    %c127 = arith.constant 127 : index
    %73 = vector.load %arg4[%c0_31, %c127] : memref<4x768xf32, #tpu.memory_space<vmem>>, vector<4x512xf32>
    %c1_i32_32 = arith.constant 1 : i32
    %74 = vector.broadcast %c1_i32_32 : i32 to vector<1x512xi32>
    %75 = arith.cmpi sge, %9, %74 : vector<1x512xi32>
    %cst_33 = arith.constant 0.000000e+00 : f32
    %76 = vector.shape_cast %75 : vector<1x512xi1> to vector<1x512xi1>
    %77 = vector.broadcast %76 : vector<1x512xi1> to vector<4x512xi1>
    %78 = vector.broadcast %cst_33 : f32 to vector<4x512xf32>
    %79 = arith.select %77, %73, %78 : vector<4x512xi1>, vector<4x512xf32>
    %c3 = arith.constant 3 : index
    %c0_34 = arith.constant 0 : index
    %c0_35 = arith.constant 0 : index
    %80 = vector.load %arg2[%c3, %c0_34, %c0_35] : memref<20x8x8xf32, #tpu.memory_space<vmem>>, vector<1x8x8xf32>
    %81 = vector.shape_cast %80 : vector<1x8x8xf32> to vector<8x8xf32>
    %82 = vector.extract_strided_slice %81 {offsets = [0, 0], sizes = [8, 4], strides = [1, 1]} : vector<8x8xf32> to vector<8x4xf32>
    %cst_36 = arith.constant dense<0.000000e+00> : vector<8x512xf32>
    %83 = tpu.matmul %82, %79, %cst_36 {dimension_numbers = #tpu.dot_dimension_numbers<[1], [0], [0], [1], [0, 0, 1, 1], [], []>} : vector<8x4xf32>, vector<4x512xf32>, vector<8x512xf32> -> vector<8x512xf32>
    %84 = arith.addf %72, %83 : vector<8x512xf32>
    %c0_37 = arith.constant 0 : index
    %c128_38 = arith.constant 128 : index
    %85 = vector.load %arg4[%c0_37, %c128_38] : memref<4x768xf32, #tpu.memory_space<vmem>>, vector<4x512xf32>
    %c4 = arith.constant 4 : index
    %c0_39 = arith.constant 0 : index
    %c0_40 = arith.constant 0 : index
    %86 = vector.load %arg2[%c4, %c0_39, %c0_40] : memref<20x8x8xf32, #tpu.memory_space<vmem>>, vector<1x8x8xf32>
    %87 = vector.shape_cast %86 : vector<1x8x8xf32> to vector<8x8xf32>
    %88 = vector.extract_strided_slice %87 {offsets = [0, 0], sizes = [8, 4], strides = [1, 1]} : vector<8x8xf32> to vector<8x4xf32>
    %cst_41 = arith.constant dense<0.000000e+00> : vector<8x512xf32>
    %89 = tpu.matmul %88, %85, %cst_41 {dimension_numbers = #tpu.dot_dimension_numbers<[1], [0], [0], [1], [0, 0, 1, 1], [], []>} : vector<8x4xf32>, vector<4x512xf32>, vector<8x512xf32> -> vector<8x512xf32>
    %90 = arith.addf %84, %89 : vector<8x512xf32>
    %c0_42 = arith.constant 0 : index
    %c129 = arith.constant 129 : index
    %91 = vector.load %arg4[%c0_42, %c129] : memref<4x768xf32, #tpu.memory_space<vmem>>, vector<4x512xf32>
    %c15_i32_43 = arith.constant 15 : i32
    %92 = vector.broadcast %c15_i32_43 : i32 to vector<1x512xi32>
    %93 = arith.cmpi slt, %9, %92 : vector<1x512xi32>
    %cst_44 = arith.constant 0.000000e+00 : f32
    %94 = vector.shape_cast %93 : vector<1x512xi1> to vector<1x512xi1>
    %95 = vector.broadcast %94 : vector<1x512xi1> to vector<4x512xi1>
    %96 = vector.broadcast %cst_44 : f32 to vector<4x512xf32>
    %97 = arith.select %95, %91, %96 : vector<4x512xi1>, vector<4x512xf32>
    %c5 = arith.constant 5 : index
    %c0_45 = arith.constant 0 : index
    %c0_46 = arith.constant 0 : index
    %98 = vector.load %arg2[%c5, %c0_45, %c0_46] : memref<20x8x8xf32, #tpu.memory_space<vmem>>, vector<1x8x8xf32>
    %99 = vector.shape_cast %98 : vector<1x8x8xf32> to vector<8x8xf32>
    %100 = vector.extract_strided_slice %99 {offsets = [0, 0], sizes = [8, 4], strides = [1, 1]} : vector<8x8xf32> to vector<8x4xf32>
    %cst_47 = arith.constant dense<0.000000e+00> : vector<8x512xf32>
    %101 = tpu.matmul %100, %97, %cst_47 {dimension_numbers = #tpu.dot_dimension_numbers<[1], [0], [0], [1], [0, 0, 1, 1], [], []>} : vector<8x4xf32>, vector<4x512xf32>, vector<8x512xf32> -> vector<8x512xf32>
    %102 = arith.addf %90, %101 : vector<8x512xf32>
    %c0_48 = arith.constant 0 : index
    %c143 = arith.constant 143 : index
    %103 = vector.load %arg4[%c0_48, %c143] : memref<4x768xf32, #tpu.memory_space<vmem>>, vector<4x512xf32>
    %c15_i32_49 = arith.constant 15 : i32
    %104 = vector.broadcast %c15_i32_49 : i32 to vector<1x512xi32>
    %105 = arith.cmpi slt, %13, %104 : vector<1x512xi32>
    %c1_i32_50 = arith.constant 1 : i32
    %106 = vector.broadcast %c1_i32_50 : i32 to vector<1x512xi32>
    %107 = arith.cmpi sge, %9, %106 : vector<1x512xi32>
    %108 = arith.andi %105, %107 : vector<1x512xi1>
    %cst_51 = arith.constant 0.000000e+00 : f32
    %109 = vector.shape_cast %108 : vector<1x512xi1> to vector<1x512xi1>
    %110 = vector.broadcast %109 : vector<1x512xi1> to vector<4x512xi1>
    %111 = vector.broadcast %cst_51 : f32 to vector<4x512xf32>
    %112 = arith.select %110, %103, %111 : vector<4x512xi1>, vector<4x512xf32>
    %c6 = arith.constant 6 : index
    %c0_52 = arith.constant 0 : index
    %c0_53 = arith.constant 0 : index
    %113 = vector.load %arg2[%c6, %c0_52, %c0_53] : memref<20x8x8xf32, #tpu.memory_space<vmem>>, vector<1x8x8xf32>
    %114 = vector.shape_cast %113 : vector<1x8x8xf32> to vector<8x8xf32>
    %115 = vector.extract_strided_slice %114 {offsets = [0, 0], sizes = [8, 4], strides = [1, 1]} : vector<8x8xf32> to vector<8x4xf32>
    %cst_54 = arith.constant dense<0.000000e+00> : vector<8x512xf32>
    %116 = tpu.matmul %115, %112, %cst_54 {dimension_numbers = #tpu.dot_dimension_numbers<[1], [0], [0], [1], [0, 0, 1, 1], [], []>} : vector<8x4xf32>, vector<4x512xf32>, vector<8x512xf32> -> vector<8x512xf32>
    %117 = arith.addf %102, %116 : vector<8x512xf32>
    %c0_55 = arith.constant 0 : index
    %c144 = arith.constant 144 : index
    %118 = vector.load %arg4[%c0_55, %c144] : memref<4x768xf32, #tpu.memory_space<vmem>>, vector<4x512xf32>
    %c15_i32_56 = arith.constant 15 : i32
    %119 = vector.broadcast %c15_i32_56 : i32 to vector<1x512xi32>
    %120 = arith.cmpi slt, %13, %119 : vector<1x512xi32>
    %cst_57 = arith.constant 0.000000e+00 : f32
    %121 = vector.shape_cast %120 : vector<1x512xi1> to vector<1x512xi1>
    %122 = vector.broadcast %121 : vector<1x512xi1> to vector<4x512xi1>
    %123 = vector.broadcast %cst_57 : f32 to vector<4x512xf32>
    %124 = arith.select %122, %118, %123 : vector<4x512xi1>, vector<4x512xf32>
    %c7 = arith.constant 7 : index
    %c0_58 = arith.constant 0 : index
    %c0_59 = arith.constant 0 : index
    %125 = vector.load %arg2[%c7, %c0_58, %c0_59] : memref<20x8x8xf32, #tpu.memory_space<vmem>>, vector<1x8x8xf32>
    %126 = vector.shape_cast %125 : vector<1x8x8xf32> to vector<8x8xf32>
    %127 = vector.extract_strided_slice %126 {offsets = [0, 0], sizes = [8, 4], strides = [1, 1]} : vector<8x8xf32> to vector<8x4xf32>
    %cst_60 = arith.constant dense<0.000000e+00> : vector<8x512xf32>
    %128 = tpu.matmul %127, %124, %cst_60 {dimension_numbers = #tpu.dot_dimension_numbers<[1], [0], [0], [1], [0, 0, 1, 1], [], []>} : vector<8x4xf32>, vector<4x512xf32>, vector<8x512xf32> -> vector<8x512xf32>
    %129 = arith.addf %117, %128 : vector<8x512xf32>
    %c0_61 = arith.constant 0 : index
    %c145 = arith.constant 145 : index
    %130 = vector.load %arg4[%c0_61, %c145] : memref<4x768xf32, #tpu.memory_space<vmem>>, vector<4x512xf32>
    %c15_i32_62 = arith.constant 15 : i32
    %131 = vector.broadcast %c15_i32_62 : i32 to vector<1x512xi32>
    %132 = arith.cmpi slt, %13, %131 : vector<1x512xi32>
    %c15_i32_63 = arith.constant 15 : i32
    %133 = vector.broadcast %c15_i32_63 : i32 to vector<1x512xi32>
    %134 = arith.cmpi slt, %9, %133 : vector<1x512xi32>
    %135 = arith.andi %132, %134 : vector<1x512xi1>
    %cst_64 = arith.constant 0.000000e+00 : f32
    %136 = vector.shape_cast %135 : vector<1x512xi1> to vector<1x512xi1>
    %137 = vector.broadcast %136 : vector<1x512xi1> to vector<4x512xi1>
    %138 = vector.broadcast %cst_64 : f32 to vector<4x512xf32>
    %139 = arith.select %137, %130, %138 : vector<4x512xi1>, vector<4x512xf32>
    %c8 = arith.constant 8 : index
    %c0_65 = arith.constant 0 : index
    %c0_66 = arith.constant 0 : index
    %140 = vector.load %arg2[%c8, %c0_65, %c0_66] : memref<20x8x8xf32, #tpu.memory_space<vmem>>, vector<1x8x8xf32>
    %141 = vector.shape_cast %140 : vector<1x8x8xf32> to vector<8x8xf32>
    %142 = vector.extract_strided_slice %141 {offsets = [0, 0], sizes = [8, 4], strides = [1, 1]} : vector<8x8xf32> to vector<8x4xf32>
    %cst_67 = arith.constant dense<0.000000e+00> : vector<8x512xf32>
    %143 = tpu.matmul %142, %139, %cst_67 {dimension_numbers = #tpu.dot_dimension_numbers<[1], [0], [0], [1], [0, 0, 1, 1], [], []>} : vector<8x4xf32>, vector<4x512xf32>, vector<8x512xf32> -> vector<8x512xf32>
    %144 = arith.addf %129, %143 : vector<8x512xf32>
    %145 = vector.broadcast %4 : vector<8x1xf32> to vector<8x512xf32>
    %146 = arith.mulf %144, %145 : vector<8x512xf32>
    %147 = vector.broadcast %5 : vector<8x1xf32> to vector<8x512xf32>
    %148 = arith.addf %146, %147 : vector<8x512xf32>
    %cst_68 = arith.constant 0.000000e+00 : f32
    %149 = vector.broadcast %cst_68 : f32 to vector<8x512xf32>
    %150 = arith.maximumf %148, %149 : vector<8x512xf32>
    %151 = vector.broadcast %6 : vector<8x1xf32> to vector<8x512xf32>
    %152 = arith.mulf %150, %151 : vector<8x512xf32>
    %c0_69 = arith.constant 0 : index
    %c128_70 = arith.constant 128 : index
    %153 = vector.load %arg5[%c0_69, %c128_70] : memref<8x768xf32, #tpu.memory_space<vmem>>, vector<8x512xf32>
    tpu.vector_store %arg5[%c0_69, %c128_70], %152 {strides = array<i32>} : memref<8x768xf32, #tpu.memory_space<vmem>>, vector<8x512xf32>,
    %c18 = arith.constant 18 : index
    %c0_71 = arith.constant 0 : index
    %c0_72 = arith.constant 0 : index
    %154 = vector.load %arg2[%c18, %c0_71, %c0_72] : memref<20x8x8xf32, #tpu.memory_space<vmem>>, vector<1x8x8xf32>
    %155 = vector.shape_cast %154 : vector<1x8x8xf32> to vector<8x8xf32>
    %156 = vector.extract_strided_slice %155 {offsets = [0, 0], sizes = [8, 4], strides = [1, 1]} : vector<8x8xf32> to vector<8x4xf32>
    %c0_73 = arith.constant 0 : index
    %c128_74 = arith.constant 128 : index
    %157 = vector.load %arg4[%c0_73, %c128_74] : memref<4x768xf32, #tpu.memory_space<vmem>>, vector<4x512xf32>
    %cst_75 = arith.constant dense<0.000000e+00> : vector<8x512xf32>
    %158 = tpu.matmul %156, %157, %cst_75 {dimension_numbers = #tpu.dot_dimension_numbers<[1], [0], [0], [1], [0, 0, 1, 1], [], []>} : vector<8x4xf32>, vector<4x512xf32>, vector<8x512xf32> -> vector<8x512xf32>
    %c0_76 = arith.constant 0 : index
    %c111_77 = arith.constant 111 : index
    %159 = vector.load %arg5[%c0_76, %c111_77] : memref<8x768xf32, #tpu.memory_space<vmem>>, vector<8x512xf32>
    %c1_i32_78 = arith.constant 1 : i32
    %160 = vector.broadcast %c1_i32_78 : i32 to vector<1x512xi32>
    %161 = arith.cmpi sge, %13, %160 : vector<1x512xi32>
    %c1_i32_79 = arith.constant 1 : i32
    %162 = vector.broadcast %c1_i32_79 : i32 to vector<1x512xi32>
    %163 = arith.cmpi sge, %9, %162 : vector<1x512xi32>
    %164 = arith.andi %161, %163 : vector<1x512xi1>
    %cst_80 = arith.constant 0.000000e+00 : f32
    %165 = vector.shape_cast %164 : vector<1x512xi1> to vector<1x512xi1>
    %166 = vector.broadcast %165 : vector<1x512xi1> to vector<8x512xi1>
    %167 = vector.broadcast %cst_80 : f32 to vector<8x512xf32>
    %168 = arith.select %166, %159, %167 : vector<8x512xi1>, vector<8x512xf32>
    %c9 = arith.constant 9 : index
    %c0_81 = arith.constant 0 : index
    %c0_82 = arith.constant 0 : index
    %169 = vector.load %arg2[%c9, %c0_81, %c0_82] : memref<20x8x8xf32, #tpu.memory_space<vmem>>, vector<1x8x8xf32>
    %170 = vector.shape_cast %169 : vector<1x8x8xf32> to vector<8x8xf32>
    %cst_83 = arith.constant dense<0.000000e+00> : vector<8x512xf32>
    %171 = tpu.matmul %170, %168, %cst_83 {dimension_numbers = #tpu.dot_dimension_numbers<[1], [0], [0], [1], [0, 0, 1, 1], [], []>} : vector<8x8xf32>, vector<8x512xf32>, vector<8x512xf32> -> vector<8x512xf32>
    %c0_84 = arith.constant 0 : index
    %c112_85 = arith.constant 112 : index
    %172 = vector.load %arg5[%c0_84, %c112_85] : memref<8x768xf32, #tpu.memory_space<vmem>>, vector<8x512xf32>
    %c1_i32_86 = arith.constant 1 : i32
    %173 = vector.broadcast %c1_i32_86 : i32 to vector<1x512xi32>
    %174 = arith.cmpi sge, %13, %173 : vector<1x512xi32>
    %cst_87 = arith.constant 0.000000e+00 : f32
    %175 = vector.shape_cast %174 : vector<1x512xi1> to vector<1x512xi1>
    %176 = vector.broadcast %175 : vector<1x512xi1> to vector<8x512xi1>
    %177 = vector.broadcast %cst_87 : f32 to vector<8x512xf32>
    %178 = arith.select %176, %172, %177 : vector<8x512xi1>, vector<8x512xf32>
    %c10 = arith.constant 10 : index
    %c0_88 = arith.constant 0 : index
    %c0_89 = arith.constant 0 : index
    %179 = vector.load %arg2[%c10, %c0_88, %c0_89] : memref<20x8x8xf32, #tpu.memory_space<vmem>>, vector<1x8x8xf32>
    %180 = vector.shape_cast %179 : vector<1x8x8xf32> to vector<8x8xf32>
    %cst_90 = arith.constant dense<0.000000e+00> : vector<8x512xf32>
    %181 = tpu.matmul %180, %178, %cst_90 {dimension_numbers = #tpu.dot_dimension_numbers<[1], [0], [0], [1], [0, 0, 1, 1], [], []>} : vector<8x8xf32>, vector<8x512xf32>, vector<8x512xf32> -> vector<8x512xf32>
    %182 = arith.addf %171, %181 : vector<8x512xf32>
    %c0_91 = arith.constant 0 : index
    %c113_92 = arith.constant 113 : index
    %183 = vector.load %arg5[%c0_91, %c113_92] : memref<8x768xf32, #tpu.memory_space<vmem>>, vector<8x512xf32>
    %c1_i32_93 = arith.constant 1 : i32
    %184 = vector.broadcast %c1_i32_93 : i32 to vector<1x512xi32>
    %185 = arith.cmpi sge, %13, %184 : vector<1x512xi32>
    %c15_i32_94 = arith.constant 15 : i32
    %186 = vector.broadcast %c15_i32_94 : i32 to vector<1x512xi32>
    %187 = arith.cmpi slt, %9, %186 : vector<1x512xi32>
    %188 = arith.andi %185, %187 : vector<1x512xi1>
    %cst_95 = arith.constant 0.000000e+00 : f32
    %189 = vector.shape_cast %188 : vector<1x512xi1> to vector<1x512xi1>
    %190 = vector.broadcast %189 : vector<1x512xi1> to vector<8x512xi1>
    %191 = vector.broadcast %cst_95 : f32 to vector<8x512xf32>
    %192 = arith.select %190, %183, %191 : vector<8x512xi1>, vector<8x512xf32>
    %c11 = arith.constant 11 : index
    %c0_96 = arith.constant 0 : index
    %c0_97 = arith.constant 0 : index
    %193 = vector.load %arg2[%c11, %c0_96, %c0_97] : memref<20x8x8xf32, #tpu.memory_space<vmem>>, vector<1x8x8xf32>
    %194 = vector.shape_cast %193 : vector<1x8x8xf32> to vector<8x8xf32>
    %cst_98 = arith.constant dense<0.000000e+00> : vector<8x512xf32>
    %195 = tpu.matmul %194, %192, %cst_98 {dimension_numbers = #tpu.dot_dimension_numbers<[1], [0], [0], [1], [0, 0, 1, 1], [], []>} : vector<8x8xf32>, vector<8x512xf32>, vector<8x512xf32> -> vector<8x512xf32>
    %196 = arith.addf %182, %195 : vector<8x512xf32>
    %c0_99 = arith.constant 0 : index
    %c127_100 = arith.constant 127 : index
    %197 = vector.load %arg5[%c0_99, %c127_100] : memref<8x768xf32, #tpu.memory_space<vmem>>, vector<8x512xf32>
    %c1_i32_101 = arith.constant 1 : i32
    %198 = vector.broadcast %c1_i32_101 : i32 to vector<1x512xi32>
    %199 = arith.cmpi sge, %9, %198 : vector<1x512xi32>
    %cst_102 = arith.constant 0.000000e+00 : f32
    %200 = vector.shape_cast %199 : vector<1x512xi1> to vector<1x512xi1>
    %201 = vector.broadcast %200 : vector<1x512xi1> to vector<8x512xi1>
    %202 = vector.broadcast %cst_102 : f32 to vector<8x512xf32>
    %203 = arith.select %201, %197, %202 : vector<8x512xi1>, vector<8x512xf32>
    %c12 = arith.constant 12 : index
    %c0_103 = arith.constant 0 : index
    %c0_104 = arith.constant 0 : index
    %204 = vector.load %arg2[%c12, %c0_103, %c0_104] : memref<20x8x8xf32, #tpu.memory_space<vmem>>, vector<1x8x8xf32>
    %205 = vector.shape_cast %204 : vector<1x8x8xf32> to vector<8x8xf32>
    %cst_105 = arith.constant dense<0.000000e+00> : vector<8x512xf32>
    %206 = tpu.matmul %205, %203, %cst_105 {dimension_numbers = #tpu.dot_dimension_numbers<[1], [0], [0], [1], [0, 0, 1, 1], [], []>} : vector<8x8xf32>, vector<8x512xf32>, vector<8x512xf32> -> vector<8x512xf32>
    %207 = arith.addf %196, %206 : vector<8x512xf32>
    %c0_106 = arith.constant 0 : index
    %c128_107 = arith.constant 128 : index
    %208 = vector.load %arg5[%c0_106, %c128_107] : memref<8x768xf32, #tpu.memory_space<vmem>>, vector<8x512xf32>
    %c13 = arith.constant 13 : index
    %c0_108 = arith.constant 0 : index
    %c0_109 = arith.constant 0 : index
    %209 = vector.load %arg2[%c13, %c0_108, %c0_109] : memref<20x8x8xf32, #tpu.memory_space<vmem>>, vector<1x8x8xf32>
    %210 = vector.shape_cast %209 : vector<1x8x8xf32> to vector<8x8xf32>
    %cst_110 = arith.constant dense<0.000000e+00> : vector<8x512xf32>
    %211 = tpu.matmul %210, %208, %cst_110 {dimension_numbers = #tpu.dot_dimension_numbers<[1], [0], [0], [1], [0, 0, 1, 1], [], []>} : vector<8x8xf32>, vector<8x512xf32>, vector<8x512xf32> -> vector<8x512xf32>
    %212 = arith.addf %207, %211 : vector<8x512xf32>
    %c0_111 = arith.constant 0 : index
    %c129_112 = arith.constant 129 : index
    %213 = vector.load %arg5[%c0_111, %c129_112] : memref<8x768xf32, #tpu.memory_space<vmem>>, vector<8x512xf32>
    %c15_i32_113 = arith.constant 15 : i32
    %214 = vector.broadcast %c15_i32_113 : i32 to vector<1x512xi32>
    %215 = arith.cmpi slt, %9, %214 : vector<1x512xi32>
    %cst_114 = arith.constant 0.000000e+00 : f32
    %216 = vector.shape_cast %215 : vector<1x512xi1> to vector<1x512xi1>
    %217 = vector.broadcast %216 : vector<1x512xi1> to vector<8x512xi1>
    %218 = vector.broadcast %cst_114 : f32 to vector<8x512xf32>
    %219 = arith.select %217, %213, %218 : vector<8x512xi1>, vector<8x512xf32>
    %c14 = arith.constant 14 : index
    %c0_115 = arith.constant 0 : index
    %c0_116 = arith.constant 0 : index
    %220 = vector.load %arg2[%c14, %c0_115, %c0_116] : memref<20x8x8xf32, #tpu.memory_space<vmem>>, vector<1x8x8xf32>
    %221 = vector.shape_cast %220 : vector<1x8x8xf32> to vector<8x8xf32>
    %cst_117 = arith.constant dense<0.000000e+00> : vector<8x512xf32>
    %222 = tpu.matmul %221, %219, %cst_117 {dimension_numbers = #tpu.dot_dimension_numbers<[1], [0], [0], [1], [0, 0, 1, 1], [], []>} : vector<8x8xf32>, vector<8x512xf32>, vector<8x512xf32> -> vector<8x512xf32>
    %223 = arith.addf %212, %222 : vector<8x512xf32>
    %c0_118 = arith.constant 0 : index
    %c143_119 = arith.constant 143 : index
    %224 = vector.load %arg5[%c0_118, %c143_119] : memref<8x768xf32, #tpu.memory_space<vmem>>, vector<8x512xf32>
    %c15_i32_120 = arith.constant 15 : i32
    %225 = vector.broadcast %c15_i32_120 : i32 to vector<1x512xi32>
    %226 = arith.cmpi slt, %13, %225 : vector<1x512xi32>
    %c1_i32_121 = arith.constant 1 : i32
    %227 = vector.broadcast %c1_i32_121 : i32 to vector<1x512xi32>
    %228 = arith.cmpi sge, %9, %227 : vector<1x512xi32>
    %229 = arith.andi %226, %228 : vector<1x512xi1>
    %cst_122 = arith.constant 0.000000e+00 : f32
    %230 = vector.shape_cast %229 : vector<1x512xi1> to vector<1x512xi1>
    %231 = vector.broadcast %230 : vector<1x512xi1> to vector<8x512xi1>
    %232 = vector.broadcast %cst_122 : f32 to vector<8x512xf32>
    %233 = arith.select %231, %224, %232 : vector<8x512xi1>, vector<8x512xf32>
    %c15 = arith.constant 15 : index
    %c0_123 = arith.constant 0 : index
    %c0_124 = arith.constant 0 : index
    %234 = vector.load %arg2[%c15, %c0_123, %c0_124] : memref<20x8x8xf32, #tpu.memory_space<vmem>>, vector<1x8x8xf32>
    %235 = vector.shape_cast %234 : vector<1x8x8xf32> to vector<8x8xf32>
    %cst_125 = arith.constant dense<0.000000e+00> : vector<8x512xf32>
    %236 = tpu.matmul %235, %233, %cst_125 {dimension_numbers = #tpu.dot_dimension_numbers<[1], [0], [0], [1], [0, 0, 1, 1], [], []>} : vector<8x8xf32>, vector<8x512xf32>, vector<8x512xf32> -> vector<8x512xf32>
    %237 = arith.addf %223, %236 : vector<8x512xf32>
    %c0_126 = arith.constant 0 : index
    %c144_127 = arith.constant 144 : index
    %238 = vector.load %arg5[%c0_126, %c144_127] : memref<8x768xf32, #tpu.memory_space<vmem>>, vector<8x512xf32>
    %c15_i32_128 = arith.constant 15 : i32
    %239 = vector.broadcast %c15_i32_128 : i32 to vector<1x512xi32>
    %240 = arith.cmpi slt, %13, %239 : vector<1x512xi32>
    %cst_129 = arith.constant 0.000000e+00 : f32
    %241 = vector.shape_cast %240 : vector<1x512xi1> to vector<1x512xi1>
    %242 = vector.broadcast %241 : vector<1x512xi1> to vector<8x512xi1>
    %243 = vector.broadcast %cst_129 : f32 to vector<8x512xf32>
    %244 = arith.select %242, %238, %243 : vector<8x512xi1>, vector<8x512xf32>
    %c16 = arith.constant 16 : index
    %c0_130 = arith.constant 0 : index
    %c0_131 = arith.constant 0 : index
    %245 = vector.load %arg2[%c16, %c0_130, %c0_131] : memref<20x8x8xf32, #tpu.memory_space<vmem>>, vector<1x8x8xf32>
    %246 = vector.shape_cast %245 : vector<1x8x8xf32> to vector<8x8xf32>
    %cst_132 = arith.constant dense<0.000000e+00> : vector<8x512xf32>
    %247 = tpu.matmul %246, %244, %cst_132 {dimension_numbers = #tpu.dot_dimension_numbers<[1], [0], [0], [1], [0, 0, 1, 1], [], []>} : vector<8x8xf32>, vector<8x512xf32>, vector<8x512xf32> -> vector<8x512xf32>
    %248 = arith.addf %237, %247 : vector<8x512xf32>
    %c0_133 = arith.constant 0 : index
    %c145_134 = arith.constant 145 : index
    %249 = vector.load %arg5[%c0_133, %c145_134] : memref<8x768xf32, #tpu.memory_space<vmem>>, vector<8x512xf32>
    %c15_i32_135 = arith.constant 15 : i32
    %250 = vector.broadcast %c15_i32_135 : i32 to vector<1x512xi32>
    %251 = arith.cmpi slt, %13, %250 : vector<1x512xi32>
    %c15_i32_136 = arith.constant 15 : i32
    %252 = vector.broadcast %c15_i32_136 : i32 to vector<1x512xi32>
    %253 = arith.cmpi slt, %9, %252 : vector<1x512xi32>
    %254 = arith.andi %251, %253 : vector<1x512xi1>
    %cst_137 = arith.constant 0.000000e+00 : f32
    %255 = vector.shape_cast %254 : vector<1x512xi1> to vector<1x512xi1>
    %256 = vector.broadcast %255 : vector<1x512xi1> to vector<8x512xi1>
    %257 = vector.broadcast %cst_137 : f32 to vector<8x512xf32>
    %258 = arith.select %256, %249, %257 : vector<8x512xi1>, vector<8x512xf32>
    %c17 = arith.constant 17 : index
    %c0_138 = arith.constant 0 : index
    %c0_139 = arith.constant 0 : index
    %259 = vector.load %arg2[%c17, %c0_138, %c0_139] : memref<20x8x8xf32, #tpu.memory_space<vmem>>, vector<1x8x8xf32>
    %260 = vector.shape_cast %259 : vector<1x8x8xf32> to vector<8x8xf32>
    %cst_140 = arith.constant dense<0.000000e+00> : vector<8x512xf32>
    %261 = tpu.matmul %260, %258, %cst_140 {dimension_numbers = #tpu.dot_dimension_numbers<[1], [0], [0], [1], [0, 0, 1, 1], [], []>} : vector<8x8xf32>, vector<8x512xf32>, vector<8x512xf32> -> vector<8x512xf32>
    %262 = arith.addf %248, %261 : vector<8x512xf32>
    %263 = arith.addf %158, %262 : vector<8x512xf32>
    %264 = vector.extract_strided_slice %263 {offsets = [0, 0], sizes = [8, 256], strides = [1, 1]} : vector<8x512xf32> to vector<8x256xf32>
    %c0_141 = arith.constant 0 : index
    %c0_142 = arith.constant 0 : index
    %c0_143 = arith.constant 0 : index
    %265 = vector.load %arg3[%c0_141, %c0_142, %c0_143] : memref<2x8x256xf32, #tpu.memory_space<vmem>>, vector<1x8x256xf32>
    %266 = vector.shape_cast %265 : vector<1x8x256xf32> to vector<8x256xf32>
    %267 = vector.shape_cast %264 : vector<8x256xf32> to vector<1x8x256xf32>
    tpu.vector_store %arg3[%c0_141, %c0_142, %c0_143], %267 {strides = array<i32>} : memref<2x8x256xf32, #tpu.memory_space<vmem>>, vector<1x8x256xf32>,
    %268 = vector.extract_strided_slice %263 {offsets = [0, 256], sizes = [8, 256], strides = [1, 1]} : vector<8x512xf32> to vector<8x256xf32>
    %c1_144 = arith.constant 1 : index
    %c0_145 = arith.constant 0 : index
    %c0_146 = arith.constant 0 : index
    %269 = vector.load %arg3[%c1_144, %c0_145, %c0_146] : memref<2x8x256xf32, #tpu.memory_space<vmem>>, vector<1x8x256xf32>
    %270 = vector.shape_cast %269 : vector<1x8x256xf32> to vector<8x256xf32>
    %271 = vector.shape_cast %268 : vector<8x256xf32> to vector<1x8x256xf32>
    tpu.vector_store %arg3[%c1_144, %c0_145, %c0_146], %271 {strides = array<i32>} : memref<2x8x256xf32, #tpu.memory_space<vmem>>, vector<1x8x256xf32>,
    return
  }
  func.func @transform_0(%arg0: i32) -> (i32, i32, i32) {
    %c0_i32 = arith.constant 0 : i32
    %c0_i32_0 = arith.constant 0 : i32
    %c0_i32_1 = arith.constant 0 : i32
    %c0_i32_2 = arith.constant 0 : i32
    return %c0_i32, %c0_i32_0, %c0_i32_1 : i32, i32, i32
  }
  func.func @transform_1(%arg0: i32) -> (i32, i32, i32) {
    %c0_i32 = arith.constant 0 : i32
    %c0_i32_0 = arith.constant 0 : i32
    %c0_i32_1 = arith.constant 0 : i32
    %c0_i32_2 = arith.constant 0 : i32
    return %c0_i32, %c0_i32_0, %c0_i32_1 : i32, i32, i32
  }
  func.func @transform_2(%arg0: i32) -> (i32, i32, i32) {
    %c0_i32 = arith.constant 0 : i32
    %c0_i32_0 = arith.constant 0 : i32
    %c0_i32_1 = arith.constant 0 : i32
    %c0_i32_2 = arith.constant 0 : i32
    return %c0_i32, %c0_i32_0, %c0_i32_1 : i32, i32, i32
  }
}

</mosaic_0001>

<bundles_post_ra>
// kernel: tpu_custom_call.1
= control target key start
LH: loop header
LB: loop body
LE: loop exit
PB: predicated region body
PF: predicated region fallthrough
CT: control target
= control target key end

     0   :  { %v3874_v1 = vmov 0   ;;  %s4659_s0 = inlined_call_operand.vmem [shape: f32[2,4,256], index: 0, kind: input, shape index: {}]   ;;  %s4660_s1 = inlined_call_operand.vmem [shape: f32[20,8,8], index: 1, kind: input, shape index: {}]   ;;  %s4661_s2 = inlined_call_operand.hbm [shape: f32[2,8,256], index: 2, kind: output, shape index: {}]  }
   0x1   :  { %v3909_v0 = vld [vmem:[%s4660_s1 + $0x98] sm:$0xff]  ;;  %3840 = vset.pattern.permute.xlu0 %v3874_v1 }
   0x2   :  { %7 = vsyncpa [#allocation5], 0  ;;  %34 = vperm.xlu0 %3840, %v3909_v0   ;;  %v3875_v2 = vmov 1   ;;  %v14_v3 = vlaneseq  ;;  %v3876_v4 = vmov 839922192   ;;  %v31_v11 = vld [vmem:[%s4659_s0] sm:$0xff] }
   0x3   :  { %v37_v5 = vunpack.c.l.s4 %v3876_v4  ;;  %v3626_v12 = vld [vmem:[%s4659_s0 + $0x8] sm:$0xff]  ;;  %s3877_s15 = smov 16   ;;  %v3878_v23 = vmov 0.0   ;;  %s3879_s0 = smov 17   ;;  %v1045_v28 = vld [vmem:[#allocation2 + $0x14] sm:$0xf] }
   0x4   :  { %v40_v7 = vshrl.u32 %v14_v3, 7  ;;  %231 = vmatprep.mubr.f32.mxu0 %v3878_v23  ;;  %302 = vmatprep.mubr.f32.mxu1 %v3878_v23  ;;  %s3880_s16 = smov 15   ;;  %s3881_s17 = smov 1   ;;  %v1457_v32 = vld [vmem:[#allocation2 + $0x14] sm:$0xf]  ;;  %v3886_v34 = vmov 2  }
   0x5   :  { %v38_v6 = vunpack.c.0.s8 %v37_v5  ;;  %s3882_s18 = smov 127   ;;  %s3883_s19 = smov 113   ;;  %v1247_v33 = vld [vmem:[#allocation2 + $0x14] sm:$0xf]  ;;  %3842 = vset.pattern.permute.xlu1 %v3886_v34  ;;  %v3887_v35 = vmov 3   ;;  %v3888_v37 = vmov 4  }
   0x6   :  { %3841 = vset.pattern.permute.xlu0 %v3875_v2  ;;  %s3884_s20 = smov 112   ;;  %s3885_s21 = smov 111   ;;  %v1659_v36 = vld [vmem:[#allocation2 + $0x14] sm:$0xf]  ;;  %v3996_v38 = vand.u32 127, %v14_v3  ;;  %vm4663_vm2 = vcmask 138240  }
   0x7   :  { %46 = vperm.xlu0 %3841, %v3909_v0   ;;  %v41_v8 = vsub.s32 %v38_v6, %v40_v7  ;;  %vm4662_vm3 = vcmask 130048   ;;  %v4696_v57 = vmov 0  ;;  %vm4666_vm6 = vcmask 1043456   ;;  %s3889_s4 = smov [#allocation4]  }
   0x8   :  { %v3999_v39 = vadd.s32 128, %v3996_v38  ;;  %v23_v43 = vshra.s32 %v3996_v38, 4  ;;  %v4004_v44 = vadd.s32 384, %v3996_v38  ;;  %v4007_v47 = vadd.s32 256, %v3996_v38  ;;  %s3614_s5 = sshll.u32 %s3889_s4, 4  ;;  %s3615_s5 = int_to_ptr.vmem [resolvable:$true] %s3614_s5 }
   0x9   :  { %v19_v50 = vand.u32 15, %v3996_v38  ;;  %v4698_v63 = vmov 0  ;;  %v4700_v4 = vmov 0  ;;  %vm4667_vm9 = vcmask 31744   ;;  %s3850_s6 = scalar_lea.vmem %s3615_s5, 512  ;;  %p3855_p1 = scmp.lt.s32.totalorder %s3615_s5, %s3615_s5 }
   0xa   :  { %v24_v42 = vshra.s32 %v3999_v39, 4  ;;  %v20_v48 = vand.u32 15, %v3999_v39  ;;  %v4013_v51 = vand.u32 15, %v23_v43  ;;  %v26_v52 = vshra.s32 %v4004_v44, 4  ;;  %p3851_p0 = scmp.ne.s32.totalorder %s3615_s5, %s3850_s6  ;;  %p3856_p2 = scmp.lt.s32.totalorder %s3850_s6, %s3850_s6 }
   0xb   :  { %3843 = vset.pattern.permute.xlu0 %v3887_v35  ;;  %v25_v55 = vshra.s32 %v4007_v47, 4  ;;  %vm4025_vm5 = vcmp.ge.s32.totalorder %v19_v50, 1  ;;  %v21_v59 = vand.u32 15, %v4007_v47  ;;  %v22_v62 = vand.u32 15, %v4004_v44 }
   0xc   :  { %v4010_v49 = vand.u32 15, %v24_v42  ;;  %vm4020_vm1 = vcmp.ge.s32.totalorder %v20_v48, 1  ;;  %vm4668_vm4 = vcmp.ge.s32.totalorder %v4013_v51, 1  ;;  %v4697_v57 = vsel %vm4025_vm5, 4294967295, %v4696_v57  ;;  %p3857_p3 = por %p3856_p2, %p3855_p1 }
   0xd   :  { %v4029_v58 = vand.u32 15, %v26_v52  ;;  %v4042_v1 = vand.u32 15, %v25_v55  ;;  %vm4050_vm8 = vmand %vm4668_vm4, %vm4025_vm5  ;;  %vm4066_vm11 = vcmp.ge.s32.totalorder %v21_v59, 1  ;;  %vm4071_vm12 = vcmp.ge.s32.totalorder %v22_v62, 1 }
   0xe   :  { %vm4670_vm0 = vcmp.ge.s32.totalorder %v4010_v49, 1  ;;  %v4701_v4 = vsel %vm4050_vm8, 4294967295, %v4700_v4  ;;  %v4716_v38 = vmov 0  ;;  %v4718_v39 = vmov 0  ;;  %p3858_p4 = pnand %p3857_p3, %p3851_p0 }
   0xf   :  { %vm4037_vm7 = vmand %vm4670_vm0, %vm4020_vm1  ;;  %vm4664_vm10 = vcmp.ge.s32.totalorder %v4029_v58, 1  ;;  %vm4665_vm13 = vcmp.ge.s32.totalorder %v4042_v1, 1 }
  0x10   :  { %v4699_v63 = vsel %vm4037_vm7, 4294967295, %v4698_v63  ;;  %vm4093_vm14 = vmand %vm4664_vm10, %vm4071_vm12 }
  0x11   :  { %vm4101_vm15 = vmand %vm4665_vm13, %vm4066_vm11 }
  0x81   :  { %v35_v9 = vpop.permute.xlu0 %34 }
  0x82   :  { %v42_v10 = vrot.slane %v35_v9, %v41_v8 }
  0x84   :  { %v44_v14 = vmul.f32 %v42_v10, %v31_v11  ;;  %v61_v15 = vmul.f32 %v3626_v12, %v42_v10  ;;  %v4702_v10 = vmov 0 }
  0x85   :  { %v4703_v10 = vsel %vm4066_vm11, 4294967295, %v4702_v10 }
  0x86   :  { %v47_v13 = vpop.permute.xlu0 %46 }
  0x87   :  { %v54_v16 = vrot.slane %v47_v13, %v41_v8  ;;  %v3627_v8 = vld [vmem:[%s4660_s1 + $0x8] sm:$0xff] }
  0x89   :  { %v56_v17 = vadd.f32 %v54_v16, %v44_v14  ;;  %v62_v18 = vadd.f32 %v61_v15, %v54_v16 }
  0x8b   :  { %v3920_v19 = vmax.f32 %v56_v17, 0.0  ;;  %v3922_v20 = vmax.f32 %v62_v18, 0.0 }
  0x8d   :  { %58 = vst [vmem:[#allocation2 + $0x4] sm:$0xff] %v3920_v19  ;;  %64 = vst [vmem:[#allocation2 + $0xc] sm:$0xff] %v3922_v20  ;;  %v3957_v30 = vcombine.high %v3920_v19, %v3920_v19  ;;  %v3965_v31 = vcombine.high %v3922_v20, %v3922_v20 }
  0x94   :  { %v67_v21 = vld [vmem:[#allocation2 + $0x10] sm:$0xf]  ;;  %v66_v22 = vld [vmem:[#allocation2 + $0x8] sm:$0xff]  ;;  %v65_v24 = vld [vmem:[#allocation2] sm:$0xff] }
  0x95   :  { %133 = vrot.lane.b32.xlu0 %v67_v21, %s3877_s15  ;;  %129 = vrot.lane.b32.xlu1 %v66_v22, %s3877_s15  ;;  %v91_v25 = vcombine.high %v65_v24, %v65_v24  ;;  %v92_v26 = vcombine.high %v66_v22, %v66_v22  ;;  %v468_v27 = vld [vmem:[#allocation2 + $0x10] sm:$0xf] }
  0x96   :  { %v678_v29 = vld [vmem:[#allocation2 + $0x10] sm:$0xf] }
  0x99   :  { %93 = vrot.lane.b32.xlu0 %v65_v24, %s3879_s0  ;;  %125 = vrot.lane.b32.xlu1 %v65_v24, %s3877_s15 }
  0x9d   :  { %97 = vrot.lane.b32.xlu1 %v66_v22, %s3879_s0  ;;  %95 = vrot.lane.b32.xlu0 %v91_v25, %s3879_s0 }
  0xa1   :  { %99 = vrot.lane.b32.xlu0 %v92_v26, %s3879_s0  ;;  %127 = vrot.lane.b32.xlu1 %v91_v25, %s3877_s15 }
  0xa5   :  { %494 = vrot.lane.b32.xlu0 %v66_v22, %s3880_s16  ;;  %131 = vrot.lane.b32.xlu1 %v92_v26, %s3877_s15 }
  0xa9   :  { %498 = vrot.lane.b32.xlu0 %v468_v27, %s3880_s16  ;;  %101 = vrot.lane.b32.xlu1 %v67_v21, %s3879_s0  ;;  %v4706_v21 = vmov 0 }
  0xaa   :  { %v4707_v21 = vsel %vm4093_vm14, 4294967295, %v4706_v21 }
  0xad   :  { %694 = vrot.lane.b32.xlu0 %v91_v25, %s3881_s17  ;;  %490 = vrot.lane.b32.xlu1 %v65_v24, %s3880_s16 }
  0xb1   :  { %698 = vrot.lane.b32.xlu0 %v92_v26, %s3881_s17  ;;  %492 = vrot.lane.b32.xlu1 %v91_v25, %s3880_s16 }
  0xb5   :  { %692 = vrot.lane.b32.xlu0 %v65_v24, %s3881_s17  ;;  %496 = vrot.lane.b32.xlu1 %v92_v26, %s3880_s16 }
  0xb9   :  { %1063 = vrot.lane.b32.xlu0 %v3922_v20, %s3882_s18  ;;  %696 = vrot.lane.b32.xlu1 %v66_v22, %s3881_s17  ;;  %v4708_v22 = vmov 0 }
  0xba   :  { %v4709_v22 = vsel %vm4101_vm15, 4294967295, %v4708_v22 }
  0xbd   :  { %1067 = vrot.lane.b32.xlu0 %v1045_v28, %s3882_s18  ;;  %700 = vrot.lane.b32.xlu1 %v678_v29, %s3881_s17  ;;  %v116_v29 = vld [vmem:[%s4660_s1] sm:$0xff] }
  0xc1   :  { %1269 = vrot.lane.b32.xlu0 %v3920_v19, %s3883_s19  ;;  %1059 = vrot.lane.b32.xlu1 %v3920_v19, %s3882_s18 }
  0xc5   :  { %1271 = vrot.lane.b32.xlu0 %v3957_v30, %s3883_s19  ;;  %1273 = vrot.lane.b32.xlu1 %v3922_v20, %s3883_s19 }
  0xc9   :  { %1275 = vrot.lane.b32.xlu0 %v3965_v31, %s3883_s19  ;;  %1061 = vrot.lane.b32.xlu1 %v3957_v30, %s3882_s18 }
  0xcd   :  { %1475 = vrot.lane.b32.xlu0 %v3922_v20, %s3884_s20  ;;  %1065 = vrot.lane.b32.xlu1 %v3965_v31, %s3882_s18 }
  0xd1   :  { %1479 = vrot.lane.b32.xlu0 %v1457_v32, %s3884_s20  ;;  %1277 = vrot.lane.b32.xlu1 %v1247_v33, %s3883_s19 }
  0xd5   :  { %1679 = vrot.lane.b32.xlu0 %v3957_v30, %s3885_s21  ;;  %1471 = vrot.lane.b32.xlu1 %v3920_v19, %s3884_s20 }
  0xd9   :  { %1683 = vrot.lane.b32.xlu0 %v3965_v31, %s3885_s21  ;;  %1473 = vrot.lane.b32.xlu1 %v3957_v30, %s3884_s20 }
  0xdd   :  { %1677 = vrot.lane.b32.xlu0 %v3920_v19, %s3885_s21  ;;  %1477 = vrot.lane.b32.xlu1 %v3965_v31, %s3884_s20 }
  0xe1   :  { %1681 = vrot.lane.b32.xlu1 %v3922_v20, %s3885_s21  ;;  %1872 = vperm.xlu0 %3843, %v3909_v0  }
  0xe5   :  { %1685 = vrot.lane.b32.xlu1 %v1659_v36, %s3885_s21  ;;  %3845 = vset.pattern.permute.xlu0 %v3888_v37 }
  0xe9   :  { %1864 = vperm.xlu1 %3842, %v3909_v0  }
  0xed   :  { %3844 = vset.pattern.permute.xlu1 %v3888_v37  ;;  %v4714_v37 = vmov 0 }
  0xee   :  { %1884 = vperm.xlu1 %3844, %v3909_v0  }
 0x107   :  { %v134_v40 = vpop.permute.xlu0 %133  ;;  %v130_v41 = vpop.permute.xlu1 %129 }
 0x10b   :  { %v94_v45 = vpop.permute.xlu0 %93  ;;  %v126_v46 = vpop.permute.xlu1 %125 }
 0x10f   :  { %v98_v53 = vpop.permute.xlu1 %97  ;;  %v96_v54 = vpop.permute.xlu0 %95 }
 0x110   :  { %v105_v0 = vsel %vm4663_vm2, %v96_v54, %v98_v53  ;;  %v104_v5 = vsel %vm4663_vm2, %v94_v45, %v96_v54 }
 0x111   :  { %v113_v9 = vsel %vm4037_vm7, %v105_v0, 0.0  ;;  %v112_v14 = vsel %vm4050_vm8, %v104_v5, 0.0  ;;  %vm4731_vm8 = vcmask 121856   ;;  %v3647_v5 = vld [vmem:[%s4660_s1 + $0x18] sm:$0xff] }
 0x112   :  { %vm4732_vm7 = vmmov %vm4731_vm8 }
 0x113   :  { %v100_v60 = vpop.permute.xlu0 %99  ;;  %v128_v61 = vpop.permute.xlu1 %127 }
 0x114   :  { %v136_v2 = vsel %vm4662_vm3, %v126_v46, %v128_v61  ;;  %v137_v3 = vsel %vm4662_vm3, %v128_v61, %v130_v41  ;;  %v106_v24 = vsel %vm4663_vm2, %v98_v53, %v100_v60 }
 0x115   :  { %v145_v6 = vsel %vm4670_vm0, %v137_v3, 0.0  ;;  %v144_v7 = vsel %vm4668_vm4, %v136_v2, 0.0  ;;  %v114_v32 = vsel %vm4101_vm15, %v106_v24, 0.0  ;;  %vm4722_vm15 = vcmask 31744  }
 0x116   :  { %3628 = vmatprep.subr.msk.mxu0 %vm4666_vm6, %v145_v6 }
 0x117   :  { %v495_v11 = vpop.permute.xlu0 %494  ;;  %3629 = vmatpush1.msk.msra.mxu0 %vm4666_vm6, %v144_v7  ;;  %v132_v12 = vpop.permute.xlu1 %131 }
 0x118   :  { %v138_v15 = vsel %vm4662_vm3, %v130_v41, %v132_v12  ;;  %3630 = vmatmul.mubr.msk.f32.vlgmr.msra.gmra.mrb[0].mxu0 %vm4667_vm9, %v3627_v8  ;;  %3634 = vmatprep.subr.msk.mxu0 %vm4666_vm6, %v113_v9  ;;  %v139_v16 = vsel %vm4662_vm3, %v132_v12, %v134_v40  ;;  %vm4118_vm3 = vcmp.lt.s32.totalorder %v19_v50, 15 }
 0x119   :  { %3635 = vmatpush1.msk.msra.mxu0 %vm4666_vm6, %v112_v14  ;;  %v147_v17 = vsel %vm4664_vm10, %v139_v16, 0.0  ;;  %v146_v18 = vsel %vm4665_vm13, %v138_v15, 0.0  ;;  %388 = vmatprep.mubr.f32.mxu0 %v3878_v23  ;;  %vm4134_vm10 = vmand %vm4668_vm4, %vm4118_vm3  ;;  %vm4672_vm13 = vcmask 121856   ;;  %vm4151_vm4 = vcmp.lt.s32.totalorder %v22_v62, 15 }
 0x11a   :  { %3631 = vmatprep.subr.msk.mxu1 %vm4666_vm6, %v147_v17  ;;  %v4715_v37 = vsel %vm4134_vm10, 4294967295, %v4714_v37 }
 0x11b   :  { %v499_v25 = vpop.permute.xlu0 %498  ;;  %3632 = vmatpush1.msk.msra.mxu1 %vm4666_vm6, %v146_v18  ;;  %v102_v26 = vpop.permute.xlu1 %101  ;;  %v4748_v18 = vmov 0 }
 0x11c   :  { %v107_v27 = vsel %vm4663_vm2, %v100_v60, %v102_v26  ;;  %3633 = vmatmul.mubr.msk.f32.vlgmr.msra.gmra.mrb[0].mxu1 %vm4667_vm9, %v3627_v8  ;;  %vm4125_vm2 = vcmp.lt.s32.totalorder %v20_v48, 15  ;;  %v3640_v48 = vld [vmem:[%s4660_s1 + $0x10] sm:$0xff] }
 0x11d   :  { %v115_v28 = vsel %vm4093_vm14, %v107_v27, 0.0  ;;  %459 = vmatprep.mubr.f32.mxu1 %v3878_v23  ;;  %v4750_v27 = vmov 0 }
 0x11e   :  { %3637 = vmatprep.subr.msk.mxu1 %vm4666_vm6, %v115_v28 }
 0x11f   :  { %v695_v34 = vpop.permute.xlu0 %694  ;;  %3638 = vmatpush1.msk.msra.mxu1 %vm4666_vm6, %v114_v32  ;;  %v491_v35 = vpop.permute.xlu1 %490  ;;  %vm4143_vm6 = vmand %vm4670_vm0, %vm4125_vm2  ;;  %vm4723_vm0 = vcmp.ge.s32.totalorder %v4042_v1, 1 }
 0x120   :  { %3636 = vmatmul.mubr.msk.f32.vlgmr.msra.gmra.mrb[0].mxu0 %vm4667_vm9, %v116_v29  ;;  %v4717_v38 = vsel %vm4143_vm6, 4294967295, %v4716_v38  ;;  %vm4147_vm9 = vcmp.lt.s32.totalorder %v21_v59, 15 }
 0x121   :  { %594 = vmatprep.mubr.f32.mxu0 %v3878_v23  ;;  %v4719_v39 = vsel %vm4147_vm9, 4294967295, %v4718_v39  ;;  %vm4166_vm14 = vmand %vm4723_vm0, %vm4147_vm9  ;;  %vm4733_vm9 = vcmask 31744  }
 0x123   :  { %v699_v40 = vpop.permute.xlu0 %698  ;;  %v493_v41 = vpop.permute.xlu1 %492 }
 0x124   :  { %v501_v43 = vsel %vm4672_vm13, %v491_v35, %v493_v41  ;;  %v502_v44 = vsel %vm4672_vm13, %v493_v41, %v495_v11  ;;  %3639 = vmatmul.mubr.msk.f32.vlgmr.msra.gmra.mrb[0].mxu1 %vm4722_vm15, %v116_v29  ;;  %vm4726_vm15 = vcmask 1043456   ;;  %vm4727_vm13 = vcmp.ge.s32.totalorder %v4029_v58, 1 }
 0x125   :  { %v509_v45 = vsel %vm4134_vm10, %v501_v43, 0.0  ;;  %v510_v46 = vsel %vm4143_vm6, %v502_v44, 0.0  ;;  %665 = vmatprep.mubr.f32.mxu1 %v3878_v23  ;;  %vm4179_vm10 = vmand %vm4727_vm13, %vm4151_vm4  ;;  %vm4679_vm6 = vcmask 7168  }
 0x126   :  { %3641 = vmatprep.subr.msk.mxu0 %vm4726_vm15, %v510_v46  ;;  %vm4730_vm0 = vmmov %vm4726_vm15 }
 0x127   :  { %v693_v52 = vpop.permute.xlu0 %692  ;;  %3642 = vmatpush1.msk.msra.mxu0 %vm4730_vm0, %v509_v45  ;;  %v497_v53 = vpop.permute.xlu1 %496  ;;  %vm4734_vm13 = vmmov %vm4730_vm0 }
 0x128   :  { %v503_v54 = vsel %vm4731_vm8, %v495_v11, %v497_v53  ;;  %v504_v55 = vsel %vm4732_vm7, %v497_v53, %v499_v25  ;;  %3643 = vmatmul.mubr.msk.f32.vlgmr.msra.gmra.mrb[0].mxu0 %vm4733_vm9, %v3640_v48  ;;  %v703_v61 = vsel %vm4679_vm6, %v693_v52, %v695_v34  ;;  %vm4735_vm15 = vmmov %vm4730_vm0  ;;  %v4759_v52 = vmov 0 }
 0x129   :  { %v511_v59 = vsel %vm4166_vm14, %v503_v54, 0.0  ;;  %v512_v60 = vsel %vm4179_vm10, %v504_v55, 0.0  ;;  %796 = vmatprep.mubr.f32.mxu0 %v3878_v23  ;;  %vm4736_vm7 = vmmov %vm4733_vm9  ;;  %v711_v6 = vsel %vm4025_vm5, %v703_v61, 0.0  ;;  %v4762_v53 = vmov 0 }
 0x12a   :  { %3644 = vmatprep.subr.msk.mxu1 %vm4734_vm13, %v512_v60  ;;  %vm4737_vm8 = vmmov %vm4730_vm0 }
 0x12b   :  { %v1064_v62 = vpop.permute.xlu0 %1063  ;;  %3645 = vmatpush1.msk.msra.mxu1 %vm4735_vm15, %v511_v59  ;;  %v697_v0 = vpop.permute.xlu1 %696  ;;  %vm4738_vm9 = vmmov %vm4730_vm0 }
 0x12c   :  { %v704_v2 = vsel %vm4679_vm6, %v695_v34, %v697_v0  ;;  %3646 = vmatmul.mubr.msk.f32.vlgmr.msra.gmra.mrb[0].mxu1 %vm4736_vm7, %v3640_v48  ;;  %v705_v7 = vsel %vm4679_vm6, %v697_v0, %v699_v40  ;;  %vm4739_vm0 = vmmov %vm4736_vm7  ;;  %v3661_v34 = vld [vmem:[%s4660_s1 + $0x28] sm:$0xff] }
 0x12d   :  { %v712_v3 = vsel %vm4020_vm1, %v704_v2, 0.0  ;;  %867 = vmatprep.mubr.f32.mxu1 %v3878_v23  ;;  %vm4740_vm13 = vmmov %vm4737_vm8  ;;  %v713_v14 = vsel %vm4066_vm11, %v705_v7, 0.0 }
 0x12e   :  { %3648 = vmatprep.subr.msk.mxu0 %vm4737_vm8, %v712_v3  ;;  %vm4741_vm15 = vmmov %vm4737_vm8 }
 0x12f   :  { %v1068_v8 = vpop.permute.xlu0 %1067  ;;  %3649 = vmatpush1.msk.msra.mxu0 %vm4738_vm9, %v711_v6  ;;  %v701_v9 = vpop.permute.xlu1 %700  ;;  %vm4742_vm7 = vmmov %vm4737_vm8 }
 0x130   :  { %v706_v11 = vsel %vm4679_vm6, %v699_v40, %v701_v9  ;;  %3650 = vmatmul.mubr.msk.f32.vlgmr.msra.gmra.mrb[0].mxu0 %vm4739_vm0, %v3647_v5  ;;  %3655 = vmatprep.subr.msk.mxu0 %vm4740_vm13, %v3957_v30  ;;  %vm4743_vm8 = vmmov %vm4742_vm7 }
 0x131   :  { %v714_v12 = vsel %vm4071_vm12, %v706_v11, 0.0  ;;  %3656 = vmatpush1.msk.msra.mxu0 %vm4741_vm15, %v3920_v19  ;;  %961 = vmatprep.mubr.f32.mxu0 %v3878_v23  ;;  %vm4744_vm9 = vmmov %vm4739_vm0  ;;  %v3654_v19 = vld [vmem:[%s4660_s1 + $0x20] sm:$0xff] }
 0x132   :  { %3651 = vmatprep.subr.msk.mxu1 %vm4742_vm7, %v714_v12  ;;  %vm4745_vm0 = vmmov %vm4742_vm7  ;;  %vm4682_vm7 = vcmask 924672   ;;  %v3675_v12 = vld [vmem:[%s4660_s1 + $0x38] sm:$0xff] }
 0x133   :  { %v1270_v15 = vpop.permute.xlu0 %1269  ;;  %3652 = vmatpush1.msk.msra.mxu1 %vm4743_vm8, %v713_v14  ;;  %v1060_v16 = vpop.permute.xlu1 %1059  ;;  %vm4746_vm13 = vmmov %vm4745_vm0  ;;  %vm4680_vm8 = vcmp.lt.s32.totalorder %v4010_v49, 15 }
 0x134   :  { %3653 = vmatmul.mubr.msk.f32.vlgmr.msra.gmra.mrb[0].mxu1 %vm4744_vm9, %v3647_v5  ;;  %3658 = vmatprep.subr.msk.mxu1 %vm4745_vm0, %v3965_v31  ;;  %vm4747_vm15 = vmmov %vm4744_vm9  ;;  %vm4685_vm9 = vcmask 1039360   ;;  %vm4681_vm0 = vcmp.lt.s32.totalorder %v4013_v51, 15 }
 0x135   :  { %3659 = vmatpush1.msk.msra.mxu1 %vm4746_vm13, %v3922_v20  ;;  %1032 = vmatprep.mubr.f32.mxu1 %v3878_v23  ;;  %vm4238_vm13 = vmand %vm4680_vm8, %vm4020_vm1 }
 0x136   :  { %v4749_v18 = vsel %vm4238_vm13, 4294967295, %v4748_v18  ;;  %vm4250_vm6 = vmand %vm4681_vm0, %vm4025_vm5  ;;  %vm4754_vm5 = vcmask 31744  }
 0x137   :  { %v1272_v30 = vpop.permute.xlu0 %1271  ;;  %v1274_v17 = vpop.permute.xlu1 %1273  ;;  %v4751_v27 = vsel %vm4250_vm6, 4294967295, %v4750_v27 }
 0x138   :  { %3657 = vmatmul.mubr.msk.f32.vlgmr.msra.gmra.mrb[0].mxu0 %vm4747_vm15, %v3654_v19  ;;  %v1281_v24 = vsel %vm4682_vm7, %v1272_v30, %v1274_v17  ;;  %v1280_v28 = vsel %vm4682_vm7, %v1270_v15, %v1272_v30 }
 0x139   :  { %1163 = vmatprep.mubr.f32.mxu0 %v3878_v23  ;;  %v1289_v35 = vsel %vm4238_vm13, %v1281_v24, 0.0  ;;  %v1288_v43 = vsel %vm4250_vm6, %v1280_v28, 0.0  ;;  %vm4756_vm13 = vnez %v4719_v39 }
 0x13b   :  { %v1276_v31 = vpop.permute.xlu0 %1275  ;;  %v1062_v20 = vpop.permute.xlu1 %1061 }
 0x13c   :  { %v1070_v25 = vsel %vm4685_vm9, %v1060_v16, %v1062_v20  ;;  %v1071_v26 = vsel %vm4685_vm9, %v1062_v20, %v1064_v62  ;;  %3660 = vmatmul.mubr.msk.f32.vlgmr.msra.gmra.mrb[0].mxu1 %vm4747_vm15, %v3654_v19  ;;  %vm4752_vm15 = vcmask 1043456   ;;  %v4784_v20 = vmov 0 }
 0x13d   :  { %v1078_v29 = vsel %vm4118_vm3, %v1070_v25, 0.0  ;;  %v1079_v32 = vsel %vm4125_vm2, %v1071_v26, 0.0  ;;  %1234 = vmatprep.mubr.f32.mxu1 %v3878_v23  ;;  %vm4753_vm8 = vmmov %vm4752_vm15 }
 0x13e   :  { %3662 = vmatprep.subr.msk.mxu0 %vm4752_vm15, %v1079_v32  ;;  %vm4755_vm15 = vmmov %vm4753_vm8 }
 0x13f   :  { %v1476_v40 = vpop.permute.xlu0 %1475  ;;  %3663 = vmatpush1.msk.msra.mxu0 %vm4753_vm8, %v1078_v29  ;;  %v1066_v41 = vpop.permute.xlu1 %1065  ;;  %vm4757_vm0 = vmmov %vm4753_vm8  ;;  %v3682_v29 = vld [vmem:[%s4660_s1 + $0x40] sm:$0xff] }
 0x140   :  { %v1072_v44 = vsel %vm4685_vm9, %v1064_v62, %v1066_v41  ;;  %v1073_v45 = vsel %vm4685_vm9, %v1066_v41, %v1068_v8  ;;  %3664 = vmatmul.mubr.msk.f32.vlgmr.msra.gmra.mrb[0].mxu0 %vm4754_vm5, %v3661_v34  ;;  %3669 = vmatprep.subr.msk.mxu0 %vm4755_vm15, %v1289_v35  ;;  %vm4758_vm9 = vcmp.lt.s32.totalorder %v4029_v58, 15  ;;  %vm4761_vm5 = vcmp.lt.s32.totalorder %v4042_v1, 15  ;;  %v3668_v62 = vld [vmem:[%s4660_s1 + $0x30] sm:$0xff] }
 0x141   :  { %v1080_v46 = vsel %vm4756_vm13, %v1072_v44, 0.0  ;;  %v1081_v48 = vsel %vm4151_vm4, %v1073_v45, 0.0  ;;  %3670 = vmatpush1.msk.msra.mxu0 %vm4753_vm8, %v1288_v43  ;;  %1373 = vmatprep.mubr.f32.mxu0 %v3878_v23  ;;  %vm4286_vm7 = vmand %vm4758_vm9, %vm4071_vm12  ;;  %vm4764_vm8 = vcmask 924672   ;;  %vm4766_vm9 = vcmask 31744  }
 0x142   :  { %3665 = vmatprep.subr.msk.mxu1 %vm4757_vm0, %v1081_v48  ;;  %v4760_v52 = vsel %vm4286_vm7, 4294967295, %v4759_v52  ;;  %vm4294_vm15 = vmand %vm4761_vm5, %vm4066_vm11  ;;  %v1282_v54 = vsel %vm4764_vm8, %v1274_v17, %v1276_v31  ;;  %vm4778_vm11 = vcmp.lt.s32.totalorder %v4029_v58, 15  ;;  %v4795_v35 = vmov 0 }
 0x143   :  { %v4763_v53 = vsel %vm4294_vm15, 4294967295, %v4762_v53  ;;  %v1480_v55 = vpop.permute.xlu0 %1479  ;;  %3666 = vmatpush1.msk.msra.mxu1 %vm4757_vm0, %v1080_v46  ;;  %v1278_v59 = vpop.permute.xlu1 %1277  ;;  %vm4765_vm6 = vmmov %vm4764_vm8  ;;  %v1290_v0 = vsel %vm4294_vm15, %v1282_v54, 0.0  ;;  %vm4771_vm15 = vcmp.lt.s32.totalorder %v4013_v51, 15  ;;  %v1899_v46 = vld [vmem:[#allocation3] sm:$0xff] }
 0x144   :  { %v1283_v60 = vsel %vm4765_vm6, %v1276_v31, %v1278_v59  ;;  %3667 = vmatmul.mubr.msk.f32.vlgmr.msra.gmra.mrb[0].mxu1 %vm4766_vm9, %v3661_v34  ;;  %vm4767_vm5 = vmmov %vm4757_vm0  ;;  %v4781_v31 = vmov 0  ;;  %1933 = vrot.lane.b32.xlu1 %v1899_v46, %s3877_s15  ;;  %v3689_v34 = vld [vmem:[%s4660_s1 + $0x90] sm:$0xff] }
 0x145   :  { %v1291_v61 = vsel %vm4286_vm7, %v1283_v60, 0.0  ;;  %1444 = vmatprep.mubr.f32.mxu1 %v3878_v23  ;;  %vm4768_vm8 = vmmov %vm4757_vm0  ;;  %vm4688_vm0 = vcmask 916480  }
 0x146   :  { %3672 = vmatprep.subr.msk.mxu1 %vm4767_vm5, %v1291_v61  ;;  %vm4769_vm6 = vmmov %vm4766_vm9  ;;  %vm4772_vm5 = vcmp.lt.s32.totalorder %v4010_v49, 15 }
 0x147   :  { %v1680_v2 = vpop.permute.xlu0 %1679  ;;  %3673 = vmatpush1.msk.msra.mxu1 %vm4768_vm8, %v1290_v0  ;;  %v1472_v3 = vpop.permute.xlu1 %1471  ;;  %vm4770_vm9 = vmmov %vm4769_vm6 }
 0x148   :  { %3671 = vmatmul.mubr.msk.f32.vlgmr.msra.gmra.mrb[0].mxu0 %vm4769_vm6, %v3668_v62  ;;  %vm4773_vm6 = vmmov %vm4768_vm8 }
 0x149   :  { %1575 = vmatprep.mubr.f32.mxu0 %v3878_v23 }
 0x14b   :  { %v1684_v5 = vpop.permute.xlu0 %1683  ;;  %v1474_v6 = vpop.permute.xlu1 %1473 }
 0x14c   :  { %v1482_v7 = vsel %vm4688_vm0, %v1472_v3, %v1474_v6  ;;  %v1483_v8 = vsel %vm4688_vm0, %v1474_v6, %v1476_v40  ;;  %3674 = vmatmul.mubr.msk.f32.vlgmr.msra.gmra.mrb[0].mxu1 %vm4770_vm9, %v3668_v62  ;;  %vm4774_vm9 = vcmask 916480  }
 0x14d   :  { %v1490_v9 = vsel %vm4771_vm15, %v1482_v7, 0.0  ;;  %v1491_v11 = vsel %vm4772_vm5, %v1483_v8, 0.0  ;;  %1646 = vmatprep.mubr.f32.mxu1 %v3878_v23  ;;  %vm4775_vm7 = vmmov %vm4774_vm9  ;;  %vm4776_vm15 = vcmask 31744   ;;  %vm4777_vm5 = vcmp.lt.s32.totalorder %v4042_v1, 15 }
 0x14e   :  { %3676 = vmatprep.subr.msk.mxu0 %vm4768_vm8, %v1491_v11  ;;  %vm4779_vm8 = vmmov %vm4773_vm6 }
 0x14f   :  { %3677 = vmatpush1.msk.msra.mxu0 %vm4773_vm6, %v1490_v9  ;;  %v1478_v14 = vpop.permute.xlu1 %1477  ;;  %v1678_v15 = vpop.permute.xlu0 %1677  ;;  %vm4780_vm6 = vcmp.lt.s32.totalorder %v4010_v49, 15 }
 0x150   :  { %v1484_v16 = vsel %vm4774_vm9, %v1476_v40, %v1478_v14  ;;  %v1485_v19 = vsel %vm4775_vm7, %v1478_v14, %v1480_v55  ;;  %3678 = vmatmul.mubr.msk.f32.vlgmr.msra.gmra.mrb[0].mxu0 %vm4776_vm15, %v3675_v12  ;;  %vm4340_vm0 = vmand %vm4780_vm6, %vm4125_vm2  ;;  %vm4783_vm7 = vcmp.lt.s32.totalorder %v4013_v51, 15 }
 0x151   :  { %v1492_v30 = vsel %vm4777_vm5, %v1484_v16, 0.0  ;;  %v1493_v17 = vsel %vm4778_vm11, %v1485_v19, 0.0  ;;  %1781 = vmatprep.mubr.f32.mxu0 %v3878_v23  ;;  %v4782_v31 = vsel %vm4340_vm0, 4294967295, %v4781_v31  ;;  %vm4348_vm9 = vmand %vm4783_vm7, %vm4118_vm3  ;;  %vm4786_vm11 = vcmask 908288  }
 0x152   :  { %3679 = vmatprep.subr.msk.mxu1 %vm4779_vm8, %v1493_v17  ;;  %v4785_v20 = vsel %vm4348_vm9, 4294967295, %v4784_v20  ;;  %v1688_v24 = vsel %vm4786_vm11, %v1678_v15, %v1680_v2  ;;  %vm4787_vm15 = vmmov %vm4779_vm8  ;;  %vm4789_vm8 = vcmask 31744   ;;  %vm4791_vm7 = vcmp.lt.s32.totalorder %v4029_v58, 15 }
 0x153   :  { %3680 = vmatpush1.msk.msra.mxu1 %vm4787_vm15, %v1492_v30  ;;  %v1682_v25 = vpop.permute.xlu1 %1681  ;;  %vm4788_vm5 = vmmov %vm4786_vm11  ;;  %v1696_v32 = vsel %vm4348_vm9, %v1688_v24, 0.0  ;;  %v2749_v24 = vld [vmem:[#allocation3 + $0x28] sm:$0xff] }
 0x154   :  { %v1689_v26 = vsel %vm4788_vm5, %v1680_v2, %v1682_v25  ;;  %3681 = vmatmul.mubr.msk.f32.vlgmr.msra.gmra.mrb[0].mxu1 %vm4789_vm8, %v3675_v12  ;;  %vm4790_vm6 = vmmov %vm4787_vm15  ;;  %vm4794_vm15 = vcmp.lt.s32.totalorder %v4042_v1, 15  ;;  %vm4797_vm8 = vcmask 908288  }
 0x155   :  { %v1697_v28 = vsel %vm4340_vm0, %v1689_v26, 0.0  ;;  %1852 = vmatprep.mubr.f32.mxu1 %v3878_v23  ;;  %vm4369_vm11 = vmand %vm4791_vm7, %vm4151_vm4  ;;  %v1690_v40 = vsel %vm4797_vm8, %v1682_v25, %v1684_v5  ;;  %vm4800_vm0 = vcmask 31744  }
 0x156   :  { %3683 = vmatprep.subr.msk.mxu0 %vm4790_vm6, %v1697_v28  ;;  %vm4377_vm5 = vmand %vm4794_vm15, %vm4756_vm13 }
 0x157   :  { %v4796_v35 = vsel %vm4377_vm5, 4294967295, %v4795_v35  ;;  %vm4798_vm9 = vmmov %vm4790_vm6  ;;  %v1686_v41 = vpop.permute.xlu1 %1685  ;;  %v1698_v45 = vsel %vm4377_vm5, %v1690_v40, 0.0 }
 0x158   :  { %3684 = vmatpush1.msk.msra.mxu0 %vm4798_vm9, %v1696_v32  ;;  %vm4799_vm6 = vmmov %vm4797_vm8 }
 0x159   :  { %v1691_v43 = vsel %vm4799_vm6, %v1684_v5, %v1686_v41  ;;  %3685 = vmatmul.mubr.msk.f32.vlgmr.msra.gmra.mrb[0].mxu0 %vm4800_vm0, %v3682_v29  ;;  %vm4801_vm7 = vmmov %vm4798_vm9  ;;  %vm4806_vm6 = vcmp.ge.s32.totalorder %v4010_v49, 1 }
 0x15a   :  { %v1699_v44 = vsel %vm4369_vm11, %v1691_v43, 0.0  ;;  %2025 = vmatprep.mubr.f32.mxu0 %v3878_v23  ;;  %vm4802_vm15 = vmmov %vm4801_vm7  ;;  %v3691_v43 = vld [vmem:[%s4660_s1 + $0x50] sm:$0xff] }
 0x15b   :  { %3686 = vmatprep.subr.msk.mxu1 %vm4801_vm7, %v1699_v44  ;;  %vm4803_vm8 = vmmov %vm4800_vm0  ;;  %vm4804_vm0 = vcmask 130048   ;;  %vm4807_vm7 = vcmp.ge.s32.totalorder %v4013_v51, 1 }
 0x15c   :  { %3687 = vmatpush1.msk.msra.mxu1 %vm4802_vm15, %v1698_v45  ;;  %vm4805_vm9 = vmmov %vm4804_vm0  ;;  %vm1957_vm15 = vcmask 64512  }
 0x15d   :  { %3688 = vmatmul.mubr.msk.f32.vlgmr.msra.gmra.mrb[0].mxu1 %vm4803_vm8, %v3682_v29  ;;  %vm4808_vm8 = vmmov %vm4804_vm0 }
 0x15e   :  { %2096 = vmatprep.mubr.f32.mxu1 %v3878_v23 }
 0x160   :  { %v1873_v55 = vpop.permute.xlu0 %1872 }
 0x168   :  { %v1865_v48 = vpop.permute.xlu1 %1864 }
 0x16d   :  { %v1885_v3 = vpop.permute.xlu1 %1884 }
 0x1b6   :  { %v1934_v25 = vpop.permute.xlu1 %1933 }
 0x22c   :  { %v1783_v54 = vpop.f32.mrb[0].mxu0 }
 0x22d   :  { %v1867_v59 = vmul.f32 %v1865_v48, %v1783_v54  ;;  %v1785_v60 = vpop.f32.mrb[1].mxu0 }
 0x22e   :  { %v1868_v61 = vmul.f32 %v1865_v48, %v1785_v60 }
 0x22f   :  { %v1875_v62 = vadd.f32 %v1873_v55, %v1867_v59 }
 0x230   :  { %v1876_v0 = vadd.f32 %v1873_v55, %v1868_v61  ;;  %v1854_v2 = vpop.f32.mrb[0].mxu1 }
 0x231   :  { %v1879_v5 = vmax.f32 %v1875_v62, 0.0  ;;  %v1869_v6 = vmul.f32 %v1865_v48, %v1854_v2  ;;  %v1856_v7 = vpop.f32.mrb[1].mxu1  ;;  %v3690_v2 = vld [vmem:[%s4660_s1 + $0x48] sm:$0xff] }
 0x232   :  { %v1880_v8 = vmax.f32 %v1876_v0, 0.0  ;;  %v1870_v9 = vmul.f32 %v1865_v48, %v1856_v7 }
 0x233   :  { %v1877_v11 = vadd.f32 %v1873_v55, %v1869_v6  ;;  %v4395_v12 = vmul.f32 %v1885_v3, %v1879_v5 }
 0x234   :  { %v1878_v14 = vadd.f32 %v1873_v55, %v1870_v9  ;;  %v4397_v15 = vmul.f32 %v1885_v3, %v1880_v8  ;;  %v3704_v8 = vld [vmem:[%s4660_s1 + $0x58] sm:$0xff] }
 0x235   :  { %v1881_v16 = vmax.f32 %v1877_v11, 0.0  ;;  %1911 = vrot.lane.b32.xlu0 %v4395_v12, %s3879_s0  ;;  %1935 = vrot.lane.b32.xlu1 %v4395_v12, %s3877_s15 }
 0x236   :  { %v1882_v19 = vmax.f32 %v1878_v14, 0.0 }
 0x237   :  { %v4403_v30 = vmul.f32 %v1885_v3, %v1881_v16 }
 0x238   :  { %v4405_v17 = vmul.f32 %v1885_v3, %v1882_v19  ;;  %v3711_v19 = vld [vmem:[%s4660_s1 + $0x60] sm:$0xff] }
 0x239   :  { %1937 = vrot.lane.b32.xlu0 %v4397_v15, %s3877_s15  ;;  %1939 = vrot.lane.b32.xlu1 %v4403_v30, %s3877_s15 }
 0x23d   :  { %1941 = vrot.lane.b32.xlu0 %v4405_v17, %s3877_s15  ;;  %2250 = vrot.lane.b32.xlu1 %v4395_v12, %s3880_s16 }
 0x241   :  { %1915 = vrot.lane.b32.xlu0 %v4403_v30, %s3879_s0  ;;  %1913 = vrot.lane.b32.xlu1 %v4397_v15, %s3879_s0 }
 0x245   :  { %1909 = vrot.lane.b32.xlu0 %v1899_v46, %s3879_s0  ;;  %1917 = vrot.lane.b32.xlu1 %v4405_v17, %s3879_s0 }
 0x249   :  { %2252 = vrot.lane.b32.xlu0 %v4397_v15, %s3880_s16  ;;  %2254 = vrot.lane.b32.xlu1 %v4403_v30, %s3880_s16 }
 0x24d   :  { %2256 = vrot.lane.b32.xlu0 %v4405_v17, %s3880_s16  ;;  %2248 = vrot.lane.b32.xlu1 %v1899_v46, %s3880_s16 }
 0x251   :  { %2423 = vrot.lane.b32.xlu0 %v4395_v12, %s3881_s17  ;;  %2425 = vrot.lane.b32.xlu1 %v4397_v15, %s3881_s17 }
 0x255   :  { %2427 = vrot.lane.b32.xlu0 %v4403_v30, %s3881_s17  ;;  %2429 = vrot.lane.b32.xlu1 %v4405_v17, %s3881_s17 }
 0x259   :  { %2421 = vrot.lane.b32.xlu0 %v1899_v46, %s3881_s17  ;;  %2755 = vrot.lane.b32.xlu1 %v4395_v12, %s3882_s18 }
 0x25d   :  { %2759 = vrot.lane.b32.xlu0 %v4403_v30, %s3882_s18  ;;  %2932 = vrot.lane.b32.xlu1 %v4403_v30, %s3883_s19 }
 0x261   :  { %2763 = vrot.lane.b32.xlu0 %v2749_v24, %s3882_s18  ;;  %2757 = vrot.lane.b32.xlu1 %v4397_v15, %s3882_s18 }
 0x265   :  { %2928 = vrot.lane.b32.xlu0 %v4395_v12, %s3883_s19  ;;  %2761 = vrot.lane.b32.xlu1 %v4405_v17, %s3882_s18 }
 0x269   :  { %2930 = vrot.lane.b32.xlu0 %v4397_v15, %s3883_s19  ;;  %2936 = vrot.lane.b32.xlu1 %v2749_v24, %s3883_s19 }
 0x26d   :  { %2934 = vrot.lane.b32.xlu0 %v4405_v17, %s3883_s19  ;;  %3101 = vrot.lane.b32.xlu1 %v4395_v12, %s3884_s20 }
 0x271   :  { %3105 = vrot.lane.b32.xlu0 %v4403_v30, %s3884_s20  ;;  %3103 = vrot.lane.b32.xlu1 %v4397_v15, %s3884_s20 }
 0x275   :  { %3109 = vrot.lane.b32.xlu0 %v2749_v24, %s3884_s20  ;;  %3107 = vrot.lane.b32.xlu1 %v4405_v17, %s3884_s20 }
 0x279   :  { %3276 = vrot.lane.b32.xlu0 %v4397_v15, %s3885_s21  ;;  %3278 = vrot.lane.b32.xlu1 %v4403_v30, %s3885_s21 }
 0x27d   :  { %3280 = vrot.lane.b32.xlu0 %v4405_v17, %s3885_s21  ;;  %3282 = vrot.lane.b32.xlu1 %v2749_v24, %s3885_s21 }
 0x281   :  { %3274 = vrot.lane.b32.xlu0 %v4395_v12, %s3885_s21 }
 0x2a7   :  { %v1912_v26 = vpop.permute.xlu0 %1911  ;;  %v1936_v28 = vpop.permute.xlu1 %1935 }
 0x2a8   :  { %v1943_v41 = vsel %vm4805_vm9, %v1934_v25, %v1936_v28  ;;  %vm4809_vm9 = vcmp.ge.s32.totalorder %v4029_v58, 1 }
 0x2ab   :  { %v1938_v29 = vpop.permute.xlu0 %1937  ;;  %v1940_v32 = vpop.permute.xlu1 %1939 }
 0x2ac   :  { %v1944_v40 = vsel %vm4804_vm0, %v1936_v28, %v1938_v29  ;;  %v1945_v48 = vsel %vm4804_vm0, %v1938_v29, %v1940_v32 }
 0x2ad   :  { %3692 = vmatprep.subr.msk.mxu0 %vm4806_vm6, %v1944_v40  ;;  %vm4810_vm6 = vcmp.ge.s32.totalorder %v4042_v1, 1  ;;  %v3721_v40 = vld [vmem:[%s4660_s1 + $0x70] sm:$0xff] }
 0x2ae   :  { %3693 = vmatpush1.msk.msra.mxu0 %vm4807_vm7, %v1943_v41  ;;  %vm4811_vm7 = vcmask 138240  }
 0x2af   :  { %v1942_v44 = vpop.permute.xlu0 %1941  ;;  %v2251_v45 = vpop.permute.xlu1 %2250  ;;  %3694 = vmatmul.mubr.msk.f32.vlgmr.msra.gmra.mrb[2].mxu0 %vm1957_vm15, %v3691_v43  ;;  %vm4813_vm0 = vmmov %vm4811_vm7 }
 0x2b0   :  { %v1946_v46 = vsel %vm4808_vm8, %v1940_v32, %v1942_v44  ;;  %2170 = vmatprep.mubr.f32.mxu0 %v3878_v23  ;;  %vm4812_vm8 = vnez %v4699_v63  ;;  %vm4814_vm5 = vmmov %vm4813_vm0 }
 0x2b1   :  { %3695 = vmatprep.subr.msk.mxu1 %vm4809_vm9, %v1946_v46  ;;  %vm4815_vm9 = vmmov %vm4813_vm0  ;;  %v3728_v46 = vld [vmem:[%s4660_s1 + $0x78] sm:$0xff] }
 0x2b2   :  { %3696 = vmatpush1.msk.msra.mxu1 %vm4810_vm6, %v1945_v48  ;;  %vm4816_vm6 = vnez %v4701_v4 }
 0x2b3   :  { %v1916_v54 = vpop.permute.xlu0 %1915  ;;  %3697 = vmatmul.mubr.msk.f32.vlgmr.msra.gmra.mrb[2].mxu1 %vm1957_vm15, %v3691_v43  ;;  %v1914_v55 = vpop.permute.xlu1 %1913 }
 0x2b4   :  { %v1920_v59 = vsel %vm4811_vm7, %v1912_v26, %v1914_v55  ;;  %2241 = vmatprep.mubr.f32.mxu1 %v3878_v23  ;;  %v1921_v3 = vsel %vm4815_vm9, %v1914_v55, %v1916_v54  ;;  %vm4817_vm7 = vnez %v4707_v21 }
 0x2b5   :  { %3698 = vmatprep.subr.msk.mxu0 %vm4812_vm8, %v1920_v59  ;;  %vm4818_vm8 = vnez %v4709_v22 }
 0x2b7   :  { %v1910_v60 = vpop.permute.xlu0 %1909  ;;  %v1918_v61 = vpop.permute.xlu1 %1917 }
 0x2b8   :  { %v1919_v62 = vsel %vm4813_vm0, %v1910_v60, %v1912_v26  ;;  %v1922_v0 = vsel %vm4814_vm5, %v1916_v54, %v1918_v61  ;;  %vm4819_vm5 = vcmask 121856   ;;  %vm4820_vm0 = vnez %v4717_v38  ;;  %v3735_v60 = vld [vmem:[%s4660_s1 + $0x80] sm:$0xff] }
 0x2b9   :  { %3699 = vmatpush1.msk.msra.mxu0 %vm4816_vm6, %v1919_v62  ;;  %3701 = vmatprep.subr.msk.mxu1 %vm4817_vm7, %v1922_v0  ;;  %vm4821_vm9 = vmmov %vm4819_vm5  ;;  %v1898_v62 = vld [vmem:[#allocation2 + $0xc] sm:$0xff] }
 0x2ba   :  { %3702 = vmatpush1.msk.msra.mxu1 %vm4818_vm8, %v1921_v3  ;;  %3700 = vmatmul.mubr.msk.f32.vlgmr.msra.gmra.mrb[2].mxu0 %vm1957_vm15, %v3690_v2  ;;  %vm4822_vm6 = vmmov %vm4819_vm5  ;;  %vm4824_vm8 = vnez %v4715_v37  ;;  %v3742_v3 = vld [vmem:[%s4660_s1 + $0x88] sm:$0xff] }
 0x2bb   :  { %v2253_v63 = vpop.permute.xlu0 %2252  ;;  %3703 = vmatmul.mubr.msk.f32.vlgmr.msra.gmra.mrb[2].mxu1 %vm1957_vm15, %v3690_v2  ;;  %v2255_v5 = vpop.permute.xlu1 %2254  ;;  %2339 = vmatprep.mubr.f32.mxu0 %v3878_v23  ;;  %vm4823_vm7 = vmmov %vm4819_vm5 }
 0x2bc   :  { %v2259_v6 = vsel %vm4819_vm5, %v2251_v45, %v2253_v63  ;;  %2410 = vmatprep.mubr.f32.mxu1 %v3878_v23  ;;  %v2260_v9 = vsel %vm4823_vm7, %v2253_v63, %v2255_v5  ;;  %vm4825_vm5 = vcmask 7168   ;;  %v1897_v63 = vld [vmem:[#allocation2 + $0x4] sm:$0xff] }
 0x2bd   :  { %3705 = vmatprep.subr.msk.mxu0 %vm4820_vm0, %v2259_v6  ;;  %vm4828_vm0 = vnez %v4703_v10 }
 0x2bf   :  { %v2257_v4 = vpop.permute.xlu0 %2256  ;;  %v2249_v21 = vpop.permute.xlu1 %2248 }
 0x2c0   :  { %v2261_v22 = vsel %vm4821_vm9, %v2255_v5, %v2257_v4  ;;  %v2258_v7 = vsel %vm4822_vm6, %v2249_v21, %v2251_v45  ;;  %vm4830_vm9 = vnez %v4697_v57  ;;  %v3449_v4 = vcombine.high %v1897_v63, %v1897_v63 }
 0x2c1   :  { %3706 = vmatpush1.msk.msra.mxu0 %vm4824_vm8, %v2258_v7  ;;  %3708 = vmatprep.subr.msk.mxu1 %vm4179_vm10, %v2261_v22  ;;  %vm4826_vm10 = vmmov %vm4825_vm5 }
 0x2c2   :  { %3709 = vmatpush1.msk.msra.mxu1 %vm4166_vm14, %v2260_v9  ;;  %3707 = vmatmul.mubr.msk.f32.vlgmr.msra.gmra.mrb[2].mxu0 %vm1957_vm15, %v3704_v8  ;;  %vm4827_vm14 = vmmov %vm4825_vm5 }
 0x2c3   :  { %v2424_v38 = vpop.permute.xlu0 %2423  ;;  %3710 = vmatmul.mubr.msk.f32.vlgmr.msra.gmra.mrb[2].mxu1 %vm1957_vm15, %v3704_v8  ;;  %v2426_v11 = vpop.permute.xlu1 %2425  ;;  %2512 = vmatprep.mubr.f32.mxu0 %v3878_v23 }
 0x2c4   :  { %v2432_v14 = vsel %vm4825_vm5, %v2424_v38, %v2426_v11  ;;  %2583 = vmatprep.mubr.f32.mxu1 %v3878_v23 }
 0x2c5   :  { %3712 = vmatprep.subr.msk.mxu0 %vm4020_vm1, %v2432_v14  ;;  %vm4829_vm1 = vmmov %vm4825_vm5  ;;  %vm4837_vm5 = vnez %v4749_v18 }
 0x2c7   :  { %v2428_v37 = vpop.permute.xlu0 %2427  ;;  %v2430_v50 = vpop.permute.xlu1 %2429 }
 0x2c8   :  { %v2433_v47 = vsel %vm4826_vm10, %v2426_v11, %v2428_v37  ;;  %v2434_v16 = vsel %vm4827_vm14, %v2428_v37, %v2430_v50  ;;  %vm4841_vm14 = vnez %v4760_v52 }
 0x2c9   :  { %3715 = vmatprep.subr.msk.mxu1 %vm4071_vm12, %v2434_v16  ;;  %vm4831_vm12 = vcmask 1039360  }
 0x2ca   :  { %3716 = vmatpush1.msk.msra.mxu1 %vm4828_vm0, %v2433_v47  ;;  %vm4832_vm6 = vmmov %vm4831_vm12  ;;  %vm4842_vm0 = vnez %v4763_v53 }
 0x2cb   :  { %v2422_v24 = vpop.permute.xlu0 %2421  ;;  %3717 = vmatmul.mubr.msk.f32.vlgmr.msra.gmra.mrb[2].mxu1 %vm1957_vm15, %v3711_v19  ;;  %2670 = vmatprep.subr.mxu1 %v4405_v17  ;;  %v2756_v56 = vpop.permute.xlu1 %2755  ;;  %v3718_v17 = vld [vmem:[%s4660_s1 + $0x68] sm:$0xff]  ;;  %vm4833_vm7 = vmmov %vm4832_vm6 }
 0x2cc   :  { %v2431_v25 = vsel %vm4829_vm1, %v2422_v24, %v2424_v38  ;;  %2671 = vmatpush1.msra.mxu1 %v4403_v30  ;;  %2734 = vmatprep.mubr.f32.mxu1 %v3878_v23  ;;  %vm4834_vm8 = vmmov %vm4832_vm6  ;;  %vm4843_vm1 = vcmask 916480  }
 0x2cd   :  { %3713 = vmatpush1.msk.msra.mxu0 %vm4830_vm9, %v2431_v25  ;;  %vm4844_vm9 = vmmov %vm4843_vm1 }
 0x2ce   :  { %3714 = vmatmul.mubr.msk.f32.vlgmr.msra.gmra.mrb[2].mxu0 %vm1957_vm15, %v3711_v19  ;;  %2599 = vmatprep.subr.mxu0 %v4397_v15 }
 0x2cf   :  { %v2760_v10 = vpop.permute.xlu0 %2759  ;;  %2600 = vmatpush1.msra.mxu0 %v4395_v12  ;;  %v2933_v13 = vpop.permute.xlu1 %2932  ;;  %2663 = vmatprep.mubr.f32.mxu0 %v3878_v23 }
 0x2d3   :  { %v2764_v30 = vpop.permute.xlu0 %2763  ;;  %3720 = vmatmul.mubr.msk.f32.vlgmr.msra.gmra.mrb[2].mxu1 %vm1957_vm15, %v3718_v17  ;;  %v2758_v26 = vpop.permute.xlu1 %2757 }
 0x2d4   :  { %v2765_v57 = vsel %vm4831_vm12, %v2756_v56, %v2758_v26  ;;  %v2766_v28 = vsel %vm4832_vm6, %v2758_v26, %v2760_v10  ;;  %2917 = vmatprep.mubr.f32.mxu1 %v3878_v23  ;;  %vm4845_vm12 = vcmp.lt.s32.totalorder %v4010_v49, 15  ;;  %vm4846_vm6 = vcmp.lt.s32.totalorder %v4013_v51, 15 }
 0x2d5   :  { %3722 = vmatprep.subr.msk.mxu0 %vm4125_vm2, %v2766_v28  ;;  %vm4835_vm2 = vcmask 924672  }
 0x2d6   :  { %3719 = vmatmul.mubr.msk.f32.vlgmr.msra.gmra.mrb[2].mxu0 %vm1957_vm15, %v3718_v17  ;;  %vm4840_vm10 = vmmov %vm4835_vm2 }
 0x2d7   :  { %3723 = vmatpush1.msk.msra.mxu0 %vm4118_vm3, %v2765_v57  ;;  %v2929_v12 = vpop.permute.xlu0 %2928  ;;  %v2762_v15 = vpop.permute.xlu1 %2761  ;;  %2846 = vmatprep.mubr.f32.mxu0 %v3878_v23  ;;  %vm4836_vm3 = vmmov %vm4835_vm2 }
 0x2d8   :  { %v2767_v29 = vsel %vm4833_vm7, %v2760_v10, %v2762_v15  ;;  %v2768_v32 = vsel %vm4834_vm8, %v2762_v15, %v2764_v30  ;;  %vm4847_vm7 = vmmov %vm4843_vm1 }
 0x2d9   :  { %3725 = vmatprep.subr.msk.mxu1 %vm4151_vm4, %v2768_v32  ;;  %vm4838_vm4 = vnez %v4751_v27  ;;  %vm4848_vm8 = vmmov %vm4843_vm1 }
 0x2da   :  { %3726 = vmatpush1.msk.msra.mxu1 %vm4756_vm13, %v2767_v29  ;;  %vm4839_vm13 = vmmov %vm4835_vm2 }
 0x2db   :  { %v2931_v33 = vpop.permute.xlu0 %2930  ;;  %3727 = vmatmul.mubr.msk.f32.vlgmr.msra.gmra.mrb[2].mxu1 %vm1957_vm15, %v3721_v40  ;;  %v2937_v36 = vpop.permute.xlu1 %2936 }
 0x2dc   :  { %v2938_v41 = vsel %vm4835_vm2, %v2929_v12, %v2931_v33  ;;  %v2939_v43 = vsel %vm4836_vm3, %v2931_v33, %v2933_v13  ;;  %3090 = vmatprep.mubr.f32.mxu1 %v3878_v23  ;;  %vm4849_vm2 = vcmp.lt.s32.totalorder %v4029_v58, 15  ;;  %vm4850_vm3 = vcmp.lt.s32.totalorder %v4042_v1, 15 }
 0x2dd   :  { %3729 = vmatprep.subr.msk.mxu0 %vm4837_vm5, %v2939_v43  ;;  %vm4851_vm5 = vcmask 908288  }
 0x2de   :  { %3724 = vmatmul.mubr.msk.f32.vlgmr.msra.gmra.mrb[2].mxu0 %vm1957_vm15, %v3721_v40 }
 0x2df   :  { %3730 = vmatpush1.msk.msra.mxu0 %vm4838_vm4, %v2938_v41  ;;  %v2935_v39 = vpop.permute.xlu0 %2934  ;;  %v3102_v42 = vpop.permute.xlu1 %3101  ;;  %3019 = vmatprep.mubr.f32.mxu0 %v3878_v23  ;;  %vm4852_vm4 = vnez %v4782_v31  ;;  %v3450_v31 = vcombine.high %v1898_v62, %v1898_v62 }
 0x2e0   :  { %v2940_v44 = vsel %vm4839_vm13, %v2933_v13, %v2935_v39  ;;  %v2941_v45 = vsel %vm4840_vm10, %v2935_v39, %v2937_v36  ;;  %vm4853_vm13 = vmmov %vm4851_vm5 }
 0x2e1   :  { %3732 = vmatprep.subr.msk.mxu1 %vm4841_vm14, %v2941_v45  ;;  %vm4854_vm10 = vmmov %vm4851_vm5  ;;  %vm4855_vm14 = vnez %v4796_v35 }
 0x2e2   :  { %3733 = vmatpush1.msk.msra.mxu1 %vm4842_vm0, %v2940_v44  ;;  %vm4856_vm0 = vcmask 1043456  }
 0x2e3   :  { %v3106_v18 = vpop.permute.xlu0 %3105  ;;  %3734 = vmatmul.mubr.msk.f32.vlgmr.msra.gmra.mrb[2].mxu1 %vm1957_vm15, %v3728_v46  ;;  %v3104_v27 = vpop.permute.xlu1 %3103 }
 0x2e4   :  { %v3111_v48 = vsel %vm4843_vm1, %v3102_v42, %v3104_v27  ;;  %v3112_v54 = vsel %vm4844_vm9, %v3104_v27, %v3106_v18  ;;  %3263 = vmatprep.mubr.f32.mxu1 %v3878_v23  ;;  %vm4857_vm1 = vmmov %vm4851_vm5 }
 0x2e5   :  { %3736 = vmatprep.subr.msk.mxu0 %vm4845_vm12, %v3112_v54  ;;  %vm4858_vm9 = vmmov %vm4856_vm0  ;;  %vm4859_vm12 = vnez %v4785_v20 }
 0x2e6   :  { %3731 = vmatmul.mubr.msk.f32.vlgmr.msra.gmra.mrb[2].mxu0 %vm1957_vm15, %v3728_v46 }
 0x2e7   :  { %3737 = vmatpush1.msk.msra.mxu0 %vm4846_vm6, %v3111_v48  ;;  %v3110_v52 = vpop.permute.xlu0 %3109  ;;  %v3108_v53 = vpop.permute.xlu1 %3107  ;;  %3192 = vmatprep.mubr.f32.mxu0 %v3878_v23  ;;  %vm4861_vm6 = vmmov %vm4856_vm0 }
 0x2e8   :  { %v3113_v55 = vsel %vm4847_vm7, %v3106_v18, %v3108_v53  ;;  %v3114_v59 = vsel %vm4848_vm8, %v3108_v53, %v3110_v52  ;;  %vm4862_vm7 = vcmask 31744  }
 0x2e9   :  { %3739 = vmatprep.subr.msk.mxu1 %vm4849_vm2, %v3114_v59  ;;  %vm4863_vm8 = vmmov %vm4862_vm7 }
 0x2ea   :  { %3740 = vmatpush1.msk.msra.mxu1 %vm4850_vm3, %v3113_v55 }
 0x2eb   :  { %v3277_v49 = vpop.permute.xlu0 %3276  ;;  %3741 = vmatmul.mubr.msk.f32.vlgmr.msra.gmra.mrb[2].mxu1 %vm1957_vm15, %v3735_v60  ;;  %v3279_v51 = vpop.permute.xlu1 %3278 }
 0x2ec   :  { %v3285_v61 = vsel %vm4851_vm5, %v3277_v49, %v3279_v51  ;;  %3436 = vmatprep.mubr.f32.mxu1 %v3878_v23 }
 0x2ed   :  { %3743 = vmatprep.subr.msk.mxu0 %vm4852_vm4, %v3285_v61 }
 0x2ee   :  { %3738 = vmatmul.mubr.msk.f32.vlgmr.msra.gmra.mrb[2].mxu0 %vm1957_vm15, %v3735_v60 }
 0x2ef   :  { %v3281_v0 = vpop.permute.xlu0 %3280  ;;  %v3283_v58 = vpop.permute.xlu1 %3282  ;;  %3365 = vmatprep.mubr.f32.mxu0 %v3878_v23 }
 0x2f0   :  { %v3286_v1 = vsel %vm4853_vm13, %v3279_v51, %v3281_v0  ;;  %v3287_v2 = vsel %vm4854_vm10, %v3281_v0, %v3283_v58 }
 0x2f1   :  { %3746 = vmatprep.subr.msk.mxu1 %vm4369_vm11, %v3287_v2  ;;  %vm4860_vm11 = vmmov %vm4856_vm0 }
 0x2f2   :  { %3747 = vmatpush1.msk.msra.mxu1 %vm4855_vm14, %v3286_v1 }
 0x2f3   :  { %v3275_v5 = vpop.permute.xlu0 %3274  ;;  %3748 = vmatmul.mubr.msk.f32.vlgmr.msra.gmra.mrb[2].mxu1 %vm1957_vm15, %v3742_v3  ;;  %3752 = vmatprep.subr.msk.mxu1 %vm4856_vm0, %v3450_v31 }
 0x2f4   :  { %v3284_v6 = vsel %vm4857_vm1, %v3275_v5, %v3277_v49  ;;  %3753 = vmatpush1.msk.msra.mxu1 %vm4858_vm9, %v1898_v62  ;;  %3597 = vmatprep.mubr.f32.mxu1 %v3878_v23 }
 0x2f5   :  { %3744 = vmatpush1.msk.msra.mxu0 %vm4859_vm12, %v3284_v6 }
 0x2f6   :  { %3745 = vmatmul.mubr.msk.f32.vlgmr.msra.gmra.mrb[2].mxu0 %vm1957_vm15, %v3742_v3  ;;  %3749 = vmatprep.subr.msk.mxu0 %vm4860_vm11, %v3449_v4 }
 0x2f7   :  { %3750 = vmatpush1.msk.msra.mxu0 %vm4861_vm6, %v1897_v63  ;;  %3526 = vmatprep.mubr.f32.mxu0 %v3878_v23 }
 0x2fb   :  { %3754 = vmatmul.mubr.msk.f32.vlgmr.msra.gmra.mrb[2].mxu1 %vm4862_vm7, %v3689_v34 }
 0x2fe   :  { %3751 = vmatmul.mubr.msk.f32.vlgmr.msra.gmra.mrb[2].mxu0 %vm4863_vm8, %v3689_v34 }
 0x3ce   :  { %v3599_v35 = vpop.f32.mrb[2].mxu1 }
 0x3cf   :  { %3607 = vst [vmem:[#allocation4 + $0x10] sm:$0xff] %v3599_v35  ;;  %v3601_v20 = vpop.f32.mrb[3].mxu1 }
 0x3d0   :  { %3608 = vst [vmem:[#allocation4 + $0x18] sm:$0xff] %v3601_v20 }
 0x3d1   :  { %v3528_v21 = vpop.f32.mrb[2].mxu0 }
 0x3d2   :  { %3604 = vst [vmem:[#allocation4] sm:$0xff] %v3528_v21  ;;  %v3530_v22 = vpop.f32.mrb[3].mxu0 }
 0x3d3   :  { %3605 = vst [vmem:[#allocation4 + $0x8] sm:$0xff] %v3530_v22 }
 0x3d4   :  { %3861 = shalt.err (!%p3858_p4)
}
 0x3d5   :  { %s3862_s8 = scalar_lea.hbm %s4661_s2, 512 }
 0x3d6   :  { %p3863_p5 = scmp.ne.s32.totalorder %s4661_s2, %s3862_s8  ;;  %p3866_p6 = scmp.lt.u32.totalorder %s3862_s8, %s4661_s2 }
 0x3d8   :  { %p3868_p7 = pnand %p3866_p6, %p3863_p5 }
 0x3da   :  { %3871 = shalt.err (!%p3868_p7)
}
 0x3db   :  { %s3890_s13 = smov 256  }
 0x3dc   :  { %3620 = dma.vmem_to_hbm [thread:$0]  %s3615_s5, 512, %s4661_s2, [#allocation5], %s3890_s13, %s3890_s13, %s3877_s15  }
 0x3dd   :  { %3872 = dma.done.wait [#allocation5], 512  }
 0x3de   :  { %3873 = vsyncadd [#allocation5], 4294966784 }
 0x3df   :  { %3624 = vsyncpa [#allocation5], 1 }

</bundles_post_ra>
